<compile_context>
chip_gen: v7x
topology: tpu7x:2x2x1
jax: 0.10.0
libtpu: 0.0.40
codegen_flags: <defaults>
</compile_context>

<pallas_src>
from typing import List

import jax
import jax.numpy as jnp
from jax import lax
from jax.experimental import pallas as pl
from jax.experimental.pallas import tpu as pltpu

LANE = 128


def _round_up(n: int, m: int = LANE) -> int:
    return ((n + m - 1) // m) * m


def _make_kernel(kernel_sizes, seq_len, cin_pads, cout_pads):
    """Fused FCN forward for ONE batch item (one grid step)."""
    n_conv = len(kernel_sizes)
    L = seq_len
    lefts = [(k - 1) // 2 for k in kernel_sizes]          # torch 'same' padding split
    rights = [k - 1 - l for k, l in zip(kernel_sizes, lefts)]
    PMAX = max(lefts)
    RMAX = max(rights)
    CMAX = max(cin_pads)

    def kernel(*refs):
        idx = 0
        x_ref = refs[idx]; idx += 1                       # (1, L, Cin_p0) bf16
        conv = []
        for _ in range(n_conv):
            conv.append((refs[idx], refs[idx + 1], refs[idx + 2]))  # w, bn scale, bn shift
            idx += 3
        bn1_s, bn1_b = refs[idx], refs[idx + 1]; idx += 2
        w1_ref, b1_ref = refs[idx], refs[idx + 1]; idx += 2
        bn2_s, bn2_b = refs[idx], refs[idx + 1]; idx += 2
        w2_ref, b2_ref = refs[idx], refs[idx + 1]; idx += 2
        out_ref = refs[idx]; idx += 1                     # (1, 1, NC_p) f32
        pad_ref = refs[idx]; idx += 1                     # (PMAX+L+RMAX, CMAX) f32 scratch
        col_ref = refs[idx]                               # (L, max K*Cin_p) bf16 scratch

        # Zero only the halo rows (center rows are always overwritten).  Done every grid
        # step so a megacore-split grid (each core starts at a different program_id) is safe.
        if PMAX > 0:
            pad_ref[0:PMAX, :] = jnp.zeros((PMAX, CMAX), jnp.float32)
        if RMAX > 0:
            pad_ref[PMAX + L:, :] = jnp.zeros((RMAX, CMAX), jnp.float32)

        # Layer-0 input into the centre of the padded activation scratch.
        pad_ref[PMAX:PMAX + L, :cin_pads[0]] = x_ref[0].astype(jnp.float32)

        h = None
        for li in range(n_conv):
            K = kernel_sizes[li]
            left = lefts[li]
            cin = cin_pads[li]
            cout = cout_pads[li]
            w_ref, s_ref, sh_ref = conv[li]

            # im2col: K shifted windows of the padded activation, laid out lane-dense in bf16.
            for j in range(K):
                a = PMAX - left + j
                col_ref[:, j * cin:(j + 1) * cin] = pad_ref[a:a + L, :cin].astype(jnp.bfloat16)

            # One MXU matmul per layer: (L, K*Cin_p) @ (K*Cin_p, Cout_p), f32 accumulation.
            acc = jnp.dot(col_ref[:, :K * cin], w_ref[...],
                          preferred_element_type=jnp.float32)          # (L, Cout_p) f32
            # folded BatchNorm1d (eval, eps=1e-3 folded in the wrapper) + ReLU, in f32.
            h = jnp.maximum(acc * s_ref[...] + sh_ref[...], 0.0)

            if li < n_conv - 1:
                pad_ref[PMAX:PMAX + L, :cout] = h                       # next layer's input

        # AdaptiveAvgPool1d(1) / AdaptiveMaxPool1d(1) over time, concat along features.
        avg = jnp.sum(h, axis=0, keepdims=True) * (1.0 / L)             # (1, F_p)
        mx = jnp.max(h, axis=0, keepdims=True)                          # (1, F_p)
        g = jnp.concatenate([avg, mx], axis=1)                          # (1, 2*F_p)

        # Head: BN1 -> dropout(id) -> Linear1 -> ReLU -> BN2 -> dropout(id) -> Linear2
        # TODO(synk): dropout is stochastic in train mode; implemented as eval-mode identity.
        g = g * bn1_s[...] + bn1_b[...]
        h1 = jnp.dot(g.astype(jnp.bfloat16), w1_ref[...],
                     preferred_element_type=jnp.float32) + b1_ref[...]
        h1 = jnp.maximum(h1, 0.0)
        h1 = h1 * bn2_s[...] + bn2_b[...]
        out = jnp.dot(h1.astype(jnp.bfloat16), w2_ref[...],
                      preferred_element_type=jnp.float32) + b2_ref[...]
        out_ref[0] = out.astype(out_ref.dtype)

    return kernel, PMAX, RMAX, CMAX


def fcn_forward_pallas(x, raw, kernel_sizes):
    """x: (B, L, channels) float32 (same tensor the torch module's forward receives)."""
    B, L, C = x.shape
    n_conv = len(kernel_sizes)
    filters = [w.shape[0] for (w, _g, _b, _m, _v) in raw["conv"]]
    num_classes = raw["lin2"][0].shape[0]
    lin_len = raw["lin1"][0].shape[0]

    cins = [C] + filters[:-1]
    cin_p = [_round_up(c) for c in cins]
    cout_p = [_round_up(f) for f in filters]
    F, Fp = filters[-1], cout_p[-1]
    lin_p = _round_up(lin_len)
    nc_p = _round_up(num_classes)

    def pad2(a, rows, cols):
        return jnp.zeros((rows, cols), jnp.float32).at[:a.shape[0], :a.shape[1]].set(a)

    inputs = []
    in_specs = []
    vmem_spec = pl.BlockSpec(memory_space=pltpu.MemorySpace.VMEM)   # small resident params

    # Input activations: channels-last, channel-padded to the lane width, bf16 in HBM.
    xp = jnp.zeros((B, L, cin_p[0]), jnp.float32).at[:, :, :C].set(x.astype(jnp.float32))
    inputs.append(xp.astype(jnp.bfloat16))
    in_specs.append(pl.BlockSpec((1, L, cin_p[0]), lambda b: (b, 0, 0)))

    # Conv layers: weight (Cout, Cin, K) -> (K, Cin, Cout) -> pad -> (K*Cin_p, Cout_p) bf16;
    # BatchNorm (eps=1e-3, eval) folded to per-channel scale/shift in f32.
    for li, ((w, g, b, m, v), K) in enumerate(zip(raw["conv"], kernel_sizes)):
        cin, cout = cins[li], filters[li]
        wt = jnp.transpose(w, (2, 1, 0))                                # (K, Cin, Cout)
        wt_p = jnp.zeros((K, cin_p[li], cout_p[li]), jnp.float32).at[:, :cin, :cout].set(wt)
        inputs.append(wt_p.reshape(K * cin_p[li], cout_p[li]).astype(jnp.bfloat16))
        s = g / jnp.sqrt(v + 1e-3)
        inputs.append(pad2(s[None, :], 1, cout_p[li]))
        inputs.append(pad2((b - m * s)[None, :], 1, cout_p[li]))
        in_specs += [vmem_spec, vmem_spec, vmem_spec]

    # Head parameters, scattered into the channel-padded [avg(Fp) | max(Fp)] layout.
    def scatter_feat(vec):                                              # (2F,) -> (1, 2*Fp)
        o = jnp.zeros((1, 2 * Fp), jnp.float32)
        o = o.at[0, :F].set(vec[:F])
        o = o.at[0, Fp:Fp + F].set(vec[F:])
        return o

    g1, b1, m1, v1 = raw["bn1"]
    s1 = g1 / jnp.sqrt(v1 + 1e-5)
    inputs += [scatter_feat(s1), scatter_feat(b1 - m1 * s1)]
    in_specs += [vmem_spec, vmem_spec]

    W1, bb1 = raw["lin1"]                                               # (lin, 2F), (lin,)
    W1t = W1.T
    W1p = jnp.zeros((2 * Fp, lin_p), jnp.float32)
    W1p = W1p.at[:F, :lin_len].set(W1t[:F])
    W1p = W1p.at[Fp:Fp + F, :lin_len].set(W1t[F:])
    inputs += [W1p.astype(jnp.bfloat16), pad2(bb1[None, :], 1, lin_p)]
    in_specs += [vmem_spec, vmem_spec]

    g2, b2, m2, v2 = raw["bn2"]
    s2 = g2 / jnp.sqrt(v2 + 1e-5)
    inputs += [pad2(s2[None, :], 1, lin_p), pad2((b2 - m2 * s2)[None, :], 1, lin_p)]
    in_specs += [vmem_spec, vmem_spec]

    W2, bb2 = raw["lin2"]                                               # (ncls, lin), (ncls,)
    inputs += [pad2(W2.T, lin_p, nc_p).astype(jnp.bfloat16), pad2(bb2[None, :], 1, nc_p)]
    in_specs += [vmem_spec, vmem_spec]

    kernel, PMAX, RMAX, CMAX = _make_kernel(tuple(kernel_sizes), L, tuple(cin_p), tuple(cout_p))
    col_w = max(k * c for k, c in zip(kernel_sizes, cin_p))

    # Advisory cost estimate so XLA can schedule around the custom call.
    conv_flops = 2 * B * L * sum(k * ci * co for k, ci, co in zip(kernel_sizes, cin_p, cout_p))
    head_flops = 2 * B * (2 * Fp * lin_p + lin_p * nc_p)
    bytes_accessed = sum(int(a.size) * a.dtype.itemsize for a in inputs) + B * nc_p * 4

    grid_spec = pltpu.PrefetchScalarGridSpec(
        num_scalar_prefetch=0,
        grid=(B,),
        in_specs=in_specs,
        out_specs=pl.BlockSpec((1, 1, nc_p), lambda b: (b, 0, 0)),
        scratch_shapes=[
            pltpu.VMEM((PMAX + L + RMAX, CMAX), jnp.float32),   # padded activation (halo stays 0)
            pltpu.VMEM((L, col_w), jnp.bfloat16),               # im2col slab (MXU operand)
        ],
    )

    out = pl.pallas_call(
        kernel,
        out_shape=jax.ShapeDtypeStruct((B, 1, nc_p), jnp.float32),
        grid_spec=grid_spec,
        compiler_params=pltpu.CompilerParams(
            dimension_semantics=("parallel",),       # batch items across TensorCores (v7x)
            vmem_limit_bytes=32 * 1024 * 1024,       # safe on v5e/v6e/v7x; far above footprint
        ),
        cost_estimate=pl.CostEstimate(
            flops=conv_flops + head_flops,
            transcendentals=0,
            bytes_accessed=bytes_accessed,
        ),
    )(*inputs)
    return out[:, 0, :num_classes]


def init_raw_params(key, channels: int, filters: List[int], kernel_sizes: List[int],
                    linear_len: int, num_classes: int):
    """Deterministic synthetic parameters in PyTorch layouts."""
    keys = iter(jax.random.split(key, 5 * len(filters) + 20))
    nrm = lambda shape, sc=0.1: sc * jax.random.normal(next(keys), shape, jnp.float32)
    uni = lambda shape: jax.random.uniform(next(keys), shape, jnp.float32, 0.5, 1.5)

    raw = {"conv": []}
    cin = channels
    for f, K in zip(filters, kernel_sizes):
        w = nrm((f, cin, K))                                   # Conv1d weight (Cout, Cin, K)
        raw["conv"].append((w, 1.0 + nrm((f,)), nrm((f,)), nrm((f,)), uni((f,))))
        cin = f
    F2 = 2 * filters[-1]
    raw["bn1"] = (1.0 + nrm((F2,)), nrm((F2,)), nrm((F2,)), uni((F2,)))
    raw["lin1"] = (nrm((linear_len, F2)), nrm((linear_len,)))
    raw["bn2"] = (1.0 + nrm((linear_len,)), nrm((linear_len,)), nrm((linear_len,)), uni((linear_len,)))
    raw["lin2"] = (nrm((num_classes, linear_len)), nrm((num_classes,)))
    return raw


def reference_forward(x, raw, kernel_sizes):
    """Pure-JAX f32 replica of the torch eval-mode forward (independent conv impl)."""
    h = jnp.transpose(x, (0, 2, 1))                            # permute(0,2,1) -> (B, C, L)
    for (w, g, b, m, v), K in zip(raw["conv"], kernel_sizes):
        left = (K - 1) // 2
        right = (K - 1) - left
        h = lax.conv_general_dilated(h, w, window_strides=(1,),
                                     padding=[(left, right)],
                                     dimension_numbers=("NCH", "OIH", "NCH"))
        s = g / jnp.sqrt(v + 1e-3)
        h = jnp.maximum(h * s[None, :, None] + (b - m * s)[None, :, None], 0.0)
    z = jnp.concatenate([jnp.mean(h, axis=2), jnp.max(h, axis=2)], axis=1)
    g1, b1, m1, v1 = raw["bn1"]
    s1 = g1 / jnp.sqrt(v1 + 1e-5)
    z = z * s1 + (b1 - m1 * s1)
    W1, bb1 = raw["lin1"]
    z = jnp.maximum(z @ W1.T + bb1, 0.0)
    g2, b2, m2, v2 = raw["bn2"]
    s2 = g2 / jnp.sqrt(v2 + 1e-5)
    z = z * s2 + (b2 - m2 * s2)
    W2, bb2 = raw["lin2"]
    return z @ W2.T + bb2


if __name__ == "__main__":
    B, L, C = 2, 16, 4
    filters = [8, 16, 8]
    kernel_sizes = [8, 5, 3]
    linear_layer_len = 32
    num_classes = 5

    key = jax.random.PRNGKey(0)
    kx, kp = jax.random.split(key)
    x = jax.random.normal(kx, (B, L, C), jnp.float32)          # module input (B, L, channels)
    raw = init_raw_params(kp, C, filters, kernel_sizes, linear_layer_len, num_classes)

    out = fcn_forward_pallas(x, raw, kernel_sizes)
    out = jax.block_until_ready(out)
    assert out.shape == (B, num_classes), out.shape

    # Kernel uses bf16 matmul operands with f32 accumulation -> compare against the pure-f32
    # reference with a bf16-appropriate tolerance.
    ref = reference_forward(x, raw, kernel_sizes)
    if not jnp.allclose(out, ref, atol=2e-2, rtol=2e-2):
        raise AssertionError(f"mismatch: max abs err {float(jnp.max(jnp.abs(out - ref)))}")

    print("KERNEL_OK")
</pallas_src>

<mosaic_0001>
module attributes {stable_mosaic.version = 11 : i64} {
  func.func @kernel(%arg0: i32, %arg1: memref<1x16x128xbf16, #tpu.memory_space<vmem>>, %arg2: memref<1024x128xbf16, #tpu.memory_space<vmem>>, %arg3: memref<1x128xf32, #tpu.memory_space<vmem>>, %arg4: memref<1x128xf32, #tpu.memory_space<vmem>>, %arg5: memref<640x128xbf16, #tpu.memory_space<vmem>>, %arg6: memref<1x128xf32, #tpu.memory_space<vmem>>, %arg7: memref<1x128xf32, #tpu.memory_space<vmem>>, %arg8: memref<384x128xbf16, #tpu.memory_space<vmem>>, %arg9: memref<1x128xf32, #tpu.memory_space<vmem>>, %arg10: memref<1x128xf32, #tpu.memory_space<vmem>>, %arg11: memref<1x256xf32, #tpu.memory_space<vmem>>, %arg12: memref<1x256xf32, #tpu.memory_space<vmem>>, %arg13: memref<256x128xbf16, #tpu.memory_space<vmem>>, %arg14: memref<1x128xf32, #tpu.memory_space<vmem>>, %arg15: memref<1x128xf32, #tpu.memory_space<vmem>>, %arg16: memref<1x128xf32, #tpu.memory_space<vmem>>, %arg17: memref<128x128xbf16, #tpu.memory_space<vmem>>, %arg18: memref<1x128xf32, #tpu.memory_space<vmem>>, %arg19: memref<1x1x128xf32, #tpu.memory_space<vmem>>, %arg20: memref<23x128xf32, #tpu.memory_space<vmem>>, %arg21: memref<16x1024xbf16, #tpu.memory_space<vmem>>) attributes {dimension_semantics = [#tpu.dimension_semantics<parallel>], iteration_bounds = array<i64: 2>, scalar_prefetch = 0 : i64, scratch_operands = 2 : i64, tpu.core_type = #tpu.core_type<tc>, window_params = [{transform_indices = @transform_0, window_bounds = array<i64: 1, 16, 128>}, {pipeline_mode = #tpu.pipeline_mode<synchronous>, transform_indices = @transform_1, window_bounds = array<i64: 1024, 128>}, {pipeline_mode = #tpu.pipeline_mode<synchronous>, transform_indices = @transform_2, window_bounds = array<i64: 1, 128>}, {pipeline_mode = #tpu.pipeline_mode<synchronous>, transform_indices = @transform_3, window_bounds = array<i64: 1, 128>}, {pipeline_mode = #tpu.pipeline_mode<synchronous>, transform_indices = @transform_4, window_bounds = array<i64: 640, 128>}, {pipeline_mode = #tpu.pipeline_mode<synchronous>, transform_indices = @transform_5, window_bounds = array<i64: 1, 128>}, {pipeline_mode = #tpu.pipeline_mode<synchronous>, transform_indices = @transform_6, window_bounds = array<i64: 1, 128>}, {pipeline_mode = #tpu.pipeline_mode<synchronous>, transform_indices = @transform_7, window_bounds = array<i64: 384, 128>}, {pipeline_mode = #tpu.pipeline_mode<synchronous>, transform_indices = @transform_8, window_bounds = array<i64: 1, 128>}, {pipeline_mode = #tpu.pipeline_mode<synchronous>, transform_indices = @transform_9, window_bounds = array<i64: 1, 128>}, {pipeline_mode = #tpu.pipeline_mode<synchronous>, transform_indices = @transform_10, window_bounds = array<i64: 1, 256>}, {pipeline_mode = #tpu.pipeline_mode<synchronous>, transform_indices = @transform_11, window_bounds = array<i64: 1, 256>}, {pipeline_mode = #tpu.pipeline_mode<synchronous>, transform_indices = @transform_12, window_bounds = array<i64: 256, 128>}, {pipeline_mode = #tpu.pipeline_mode<synchronous>, transform_indices = @transform_13, window_bounds = array<i64: 1, 128>}, {pipeline_mode = #tpu.pipeline_mode<synchronous>, transform_indices = @transform_14, window_bounds = array<i64: 1, 128>}, {pipeline_mode = #tpu.pipeline_mode<synchronous>, transform_indices = @transform_15, window_bounds = array<i64: 1, 128>}, {pipeline_mode = #tpu.pipeline_mode<synchronous>, transform_indices = @transform_16, window_bounds = array<i64: 128, 128>}, {pipeline_mode = #tpu.pipeline_mode<synchronous>, transform_indices = @transform_17, window_bounds = array<i64: 1, 128>}, {transform_indices = @transform_18, window_bounds = array<i64: 1, 1, 128>}]} {
    %cst = arith.constant 0.000000e+00 : f32
    %0 = vector.broadcast %cst : f32 to vector<3x128xf32>
    %c0 = arith.constant 0 : index
    %c0_0 = arith.constant 0 : index
    %1 = vector.load %arg20[%c0, %c0_0] : memref<23x128xf32, #tpu.memory_space<vmem>>, vector<3x128xf32>
    tpu.vector_store %arg20[%c0, %c0_0], %0 {strides = array<i32>} : memref<23x128xf32, #tpu.memory_space<vmem>>, vector<3x128xf32>,
    %cst_1 = arith.constant 0.000000e+00 : f32
    %2 = vector.broadcast %cst_1 : f32 to vector<4x128xf32>
    %c19 = arith.constant 19 : index
    %c0_2 = arith.constant 0 : index
    %3 = vector.load %arg20[%c19, %c0_2] : memref<23x128xf32, #tpu.memory_space<vmem>>, vector<4x128xf32>
    tpu.vector_store %arg20[%c19, %c0_2], %2 {strides = array<i32>} : memref<23x128xf32, #tpu.memory_space<vmem>>, vector<4x128xf32>,
    %c0_3 = arith.constant 0 : index
    %c0_4 = arith.constant 0 : index
    %c0_5 = arith.constant 0 : index
    %4 = vector.load %arg1[%c0_3, %c0_4, %c0_5] : memref<1x16x128xbf16, #tpu.memory_space<vmem>>, vector<1x16x128xbf16>
    %5 = vector.shape_cast %4 : vector<1x16x128xbf16> to vector<16x128xbf16>
    %6 = arith.extf %5 : vector<16x128xbf16> to vector<16x128xf32>
    %c3 = arith.constant 3 : index
    %c0_6 = arith.constant 0 : index
    %7 = vector.load %arg20[%c3, %c0_6] : memref<23x128xf32, #tpu.memory_space<vmem>>, vector<16x128xf32>
    tpu.vector_store %arg20[%c3, %c0_6], %6 {strides = array<i32>} : memref<23x128xf32, #tpu.memory_space<vmem>>, vector<16x128xf32>,
    %c0_7 = arith.constant 0 : index
    %c0_8 = arith.constant 0 : index
    %8 = vector.load %arg20[%c0_7, %c0_8] : memref<23x128xf32, #tpu.memory_space<vmem>>, vector<16x128xf32>
    %9 = arith.truncf %8 : vector<16x128xf32> to vector<16x128xbf16>
    %c0_9 = arith.constant 0 : index
    %c0_10 = arith.constant 0 : index
    %10 = vector.load %arg21[%c0_9, %c0_10] : memref<16x1024xbf16, #tpu.memory_space<vmem>>, vector<16x128xbf16>
    tpu.vector_store %arg21[%c0_9, %c0_10], %9 {strides = array<i32>} : memref<16x1024xbf16, #tpu.memory_space<vmem>>, vector<16x128xbf16>,
    %c1 = arith.constant 1 : index
    %c0_11 = arith.constant 0 : index
    %11 = vector.load %arg20[%c1, %c0_11] : memref<23x128xf32, #tpu.memory_space<vmem>>, vector<16x128xf32>
    %12 = arith.truncf %11 : vector<16x128xf32> to vector<16x128xbf16>
    %c0_12 = arith.constant 0 : index
    %c128 = arith.constant 128 : index
    %13 = vector.load %arg21[%c0_12, %c128] : memref<16x1024xbf16, #tpu.memory_space<vmem>>, vector<16x128xbf16>
    tpu.vector_store %arg21[%c0_12, %c128], %12 {strides = array<i32>} : memref<16x1024xbf16, #tpu.memory_space<vmem>>, vector<16x128xbf16>,
    %c2 = arith.constant 2 : index
    %c0_13 = arith.constant 0 : index
    %14 = vector.load %arg20[%c2, %c0_13] : memref<23x128xf32, #tpu.memory_space<vmem>>, vector<16x128xf32>
    %15 = arith.truncf %14 : vector<16x128xf32> to vector<16x128xbf16>
    %c0_14 = arith.constant 0 : index
    %c256 = arith.constant 256 : index
    %16 = vector.load %arg21[%c0_14, %c256] : memref<16x1024xbf16, #tpu.memory_space<vmem>>, vector<16x128xbf16>
    tpu.vector_store %arg21[%c0_14, %c256], %15 {strides = array<i32>} : memref<16x1024xbf16, #tpu.memory_space<vmem>>, vector<16x128xbf16>,
    %c3_15 = arith.constant 3 : index
    %c0_16 = arith.constant 0 : index
    %17 = vector.load %arg20[%c3_15, %c0_16] : memref<23x128xf32, #tpu.memory_space<vmem>>, vector<16x128xf32>
    %18 = arith.truncf %17 : vector<16x128xf32> to vector<16x128xbf16>
    %c0_17 = arith.constant 0 : index
    %c384 = arith.constant 384 : index
    %19 = vector.load %arg21[%c0_17, %c384] : memref<16x1024xbf16, #tpu.memory_space<vmem>>, vector<16x128xbf16>
    tpu.vector_store %arg21[%c0_17, %c384], %18 {strides = array<i32>} : memref<16x1024xbf16, #tpu.memory_space<vmem>>, vector<16x128xbf16>,
    %c4 = arith.constant 4 : index
    %c0_18 = arith.constant 0 : index
    %20 = vector.load %arg20[%c4, %c0_18] : memref<23x128xf32, #tpu.memory_space<vmem>>, vector<16x128xf32>
    %21 = arith.truncf %20 : vector<16x128xf32> to vector<16x128xbf16>
    %c0_19 = arith.constant 0 : index
    %c512 = arith.constant 512 : index
    %22 = vector.load %arg21[%c0_19, %c512] : memref<16x1024xbf16, #tpu.memory_space<vmem>>, vector<16x128xbf16>
    tpu.vector_store %arg21[%c0_19, %c512], %21 {strides = array<i32>} : memref<16x1024xbf16, #tpu.memory_space<vmem>>, vector<16x128xbf16>,
    %c5 = arith.constant 5 : index
    %c0_20 = arith.constant 0 : index
    %23 = vector.load %arg20[%c5, %c0_20] : memref<23x128xf32, #tpu.memory_space<vmem>>, vector<16x128xf32>
    %24 = arith.truncf %23 : vector<16x128xf32> to vector<16x128xbf16>
    %c0_21 = arith.constant 0 : index
    %c640 = arith.constant 640 : index
    %25 = vector.load %arg21[%c0_21, %c640] : memref<16x1024xbf16, #tpu.memory_space<vmem>>, vector<16x128xbf16>
    tpu.vector_store %arg21[%c0_21, %c640], %24 {strides = array<i32>} : memref<16x1024xbf16, #tpu.memory_space<vmem>>, vector<16x128xbf16>,
    %c6 = arith.constant 6 : index
    %c0_22 = arith.constant 0 : index
    %26 = vector.load %arg20[%c6, %c0_22] : memref<23x128xf32, #tpu.memory_space<vmem>>, vector<16x128xf32>
    %27 = arith.truncf %26 : vector<16x128xf32> to vector<16x128xbf16>
    %c0_23 = arith.constant 0 : index
    %c768 = arith.constant 768 : index
    %28 = vector.load %arg21[%c0_23, %c768] : memref<16x1024xbf16, #tpu.memory_space<vmem>>, vector<16x128xbf16>
    tpu.vector_store %arg21[%c0_23, %c768], %27 {strides = array<i32>} : memref<16x1024xbf16, #tpu.memory_space<vmem>>, vector<16x128xbf16>,
    %c7 = arith.constant 7 : index
    %c0_24 = arith.constant 0 : index
    %29 = vector.load %arg20[%c7, %c0_24] : memref<23x128xf32, #tpu.memory_space<vmem>>, vector<16x128xf32>
    %30 = arith.truncf %29 : vector<16x128xf32> to vector<16x128xbf16>
    %c0_25 = arith.constant 0 : index
    %c896 = arith.constant 896 : index
    %31 = vector.load %arg21[%c0_25, %c896] : memref<16x1024xbf16, #tpu.memory_space<vmem>>, vector<16x128xbf16>
    tpu.vector_store %arg21[%c0_25, %c896], %30 {strides = array<i32>} : memref<16x1024xbf16, #tpu.memory_space<vmem>>, vector<16x128xbf16>,
    %c0_26 = arith.constant 0 : index
    %c0_27 = arith.constant 0 : index
    %32 = vector.load %arg21[%c0_26, %c0_27] : memref<16x1024xbf16, #tpu.memory_space<vmem>>, vector<16x1024xbf16>
    %c0_28 = arith.constant 0 : index
    %c0_29 = arith.constant 0 : index
    %33 = vector.load %arg2[%c0_28, %c0_29] : memref<1024x128xbf16, #tpu.memory_space<vmem>>, vector<1024x128xbf16>
    %cst_30 = arith.constant dense<0.000000e+00> : vector<16x128xf32>
    %34 = tpu.matmul %32, %33, %cst_30 {dimension_numbers = #tpu.dot_dimension_numbers<[1], [0], [0], [1], [0, 0, 1, 1], [], []>} : vector<16x1024xbf16>, vector<1024x128xbf16>, vector<16x128xf32> -> vector<16x128xf32>
    %c0_31 = arith.constant 0 : index
    %c0_32 = arith.constant 0 : index
    %35 = vector.load %arg3[%c0_31, %c0_32] : memref<1x128xf32, #tpu.memory_space<vmem>>, vector<1x128xf32>
    %36 = vector.broadcast %35 : vector<1x128xf32> to vector<16x128xf32>
    %37 = arith.mulf %34, %36 : vector<16x128xf32>
    %c0_33 = arith.constant 0 : index
    %c0_34 = arith.constant 0 : index
    %38 = vector.load %arg4[%c0_33, %c0_34] : memref<1x128xf32, #tpu.memory_space<vmem>>, vector<1x128xf32>
    %39 = vector.broadcast %38 : vector<1x128xf32> to vector<16x128xf32>
    %40 = arith.addf %37, %39 : vector<16x128xf32>
    %cst_35 = arith.constant 0.000000e+00 : f32
    %41 = vector.broadcast %cst_35 : f32 to vector<16x128xf32>
    %42 = arith.maximumf %40, %41 : vector<16x128xf32>
    %c3_36 = arith.constant 3 : index
    %c0_37 = arith.constant 0 : index
    %43 = vector.load %arg20[%c3_36, %c0_37] : memref<23x128xf32, #tpu.memory_space<vmem>>, vector<16x128xf32>
    tpu.vector_store %arg20[%c3_36, %c0_37], %42 {strides = array<i32>} : memref<23x128xf32, #tpu.memory_space<vmem>>, vector<16x128xf32>,
    %c1_38 = arith.constant 1 : index
    %c0_39 = arith.constant 0 : index
    %44 = vector.load %arg20[%c1_38, %c0_39] : memref<23x128xf32, #tpu.memory_space<vmem>>, vector<16x128xf32>
    %45 = arith.truncf %44 : vector<16x128xf32> to vector<16x128xbf16>
    %c0_40 = arith.constant 0 : index
    %c0_41 = arith.constant 0 : index
    %46 = vector.load %arg21[%c0_40, %c0_41] : memref<16x1024xbf16, #tpu.memory_space<vmem>>, vector<16x128xbf16>
    tpu.vector_store %arg21[%c0_40, %c0_41], %45 {strides = array<i32>} : memref<16x1024xbf16, #tpu.memory_space<vmem>>, vector<16x128xbf16>,
    %c2_42 = arith.constant 2 : index
    %c0_43 = arith.constant 0 : index
    %47 = vector.load %arg20[%c2_42, %c0_43] : memref<23x128xf32, #tpu.memory_space<vmem>>, vector<16x128xf32>
    %48 = arith.truncf %47 : vector<16x128xf32> to vector<16x128xbf16>
    %c0_44 = arith.constant 0 : index
    %c128_45 = arith.constant 128 : index
    %49 = vector.load %arg21[%c0_44, %c128_45] : memref<16x1024xbf16, #tpu.memory_space<vmem>>, vector<16x128xbf16>
    tpu.vector_store %arg21[%c0_44, %c128_45], %48 {strides = array<i32>} : memref<16x1024xbf16, #tpu.memory_space<vmem>>, vector<16x128xbf16>,
    %c3_46 = arith.constant 3 : index
    %c0_47 = arith.constant 0 : index
    %50 = vector.load %arg20[%c3_46, %c0_47] : memref<23x128xf32, #tpu.memory_space<vmem>>, vector<16x128xf32>
    %51 = arith.truncf %50 : vector<16x128xf32> to vector<16x128xbf16>
    %c0_48 = arith.constant 0 : index
    %c256_49 = arith.constant 256 : index
    %52 = vector.load %arg21[%c0_48, %c256_49] : memref<16x1024xbf16, #tpu.memory_space<vmem>>, vector<16x128xbf16>
    tpu.vector_store %arg21[%c0_48, %c256_49], %51 {strides = array<i32>} : memref<16x1024xbf16, #tpu.memory_space<vmem>>, vector<16x128xbf16>,
    %c4_50 = arith.constant 4 : index
    %c0_51 = arith.constant 0 : index
    %53 = vector.load %arg20[%c4_50, %c0_51] : memref<23x128xf32, #tpu.memory_space<vmem>>, vector<16x128xf32>
    %54 = arith.truncf %53 : vector<16x128xf32> to vector<16x128xbf16>
    %c0_52 = arith.constant 0 : index
    %c384_53 = arith.constant 384 : index
    %55 = vector.load %arg21[%c0_52, %c384_53] : memref<16x1024xbf16, #tpu.memory_space<vmem>>, vector<16x128xbf16>
    tpu.vector_store %arg21[%c0_52, %c384_53], %54 {strides = array<i32>} : memref<16x1024xbf16, #tpu.memory_space<vmem>>, vector<16x128xbf16>,
    %c5_54 = arith.constant 5 : index
    %c0_55 = arith.constant 0 : index
    %56 = vector.load %arg20[%c5_54, %c0_55] : memref<23x128xf32, #tpu.memory_space<vmem>>, vector<16x128xf32>
    %57 = arith.truncf %56 : vector<16x128xf32> to vector<16x128xbf16>
    %c0_56 = arith.constant 0 : index
    %c512_57 = arith.constant 512 : index
    %58 = vector.load %arg21[%c0_56, %c512_57] : memref<16x1024xbf16, #tpu.memory_space<vmem>>, vector<16x128xbf16>
    tpu.vector_store %arg21[%c0_56, %c512_57], %57 {strides = array<i32>} : memref<16x1024xbf16, #tpu.memory_space<vmem>>, vector<16x128xbf16>,
    %c0_58 = arith.constant 0 : index
    %c0_59 = arith.constant 0 : index
    %59 = vector.load %arg21[%c0_58, %c0_59] : memref<16x1024xbf16, #tpu.memory_space<vmem>>, vector<16x640xbf16>
    %c0_60 = arith.constant 0 : index
    %c0_61 = arith.constant 0 : index
    %60 = vector.load %arg5[%c0_60, %c0_61] : memref<640x128xbf16, #tpu.memory_space<vmem>>, vector<640x128xbf16>
    %cst_62 = arith.constant dense<0.000000e+00> : vector<16x128xf32>
    %61 = tpu.matmul %59, %60, %cst_62 {dimension_numbers = #tpu.dot_dimension_numbers<[1], [0], [0], [1], [0, 0, 1, 1], [], []>} : vector<16x640xbf16>, vector<640x128xbf16>, vector<16x128xf32> -> vector<16x128xf32>
    %c0_63 = arith.constant 0 : index
    %c0_64 = arith.constant 0 : index
    %62 = vector.load %arg6[%c0_63, %c0_64] : memref<1x128xf32, #tpu.memory_space<vmem>>, vector<1x128xf32>
    %63 = vector.broadcast %62 : vector<1x128xf32> to vector<16x128xf32>
    %64 = arith.mulf %61, %63 : vector<16x128xf32>
    %c0_65 = arith.constant 0 : index
    %c0_66 = arith.constant 0 : index
    %65 = vector.load %arg7[%c0_65, %c0_66] : memref<1x128xf32, #tpu.memory_space<vmem>>, vector<1x128xf32>
    %66 = vector.broadcast %65 : vector<1x128xf32> to vector<16x128xf32>
    %67 = arith.addf %64, %66 : vector<16x128xf32>
    %cst_67 = arith.constant 0.000000e+00 : f32
    %68 = vector.broadcast %cst_67 : f32 to vector<16x128xf32>
    %69 = arith.maximumf %67, %68 : vector<16x128xf32>
    %c3_68 = arith.constant 3 : index
    %c0_69 = arith.constant 0 : index
    %70 = vector.load %arg20[%c3_68, %c0_69] : memref<23x128xf32, #tpu.memory_space<vmem>>, vector<16x128xf32>
    tpu.vector_store %arg20[%c3_68, %c0_69], %69 {strides = array<i32>} : memref<23x128xf32, #tpu.memory_space<vmem>>, vector<16x128xf32>,
    %c2_70 = arith.constant 2 : index
    %c0_71 = arith.constant 0 : index
    %71 = vector.load %arg20[%c2_70, %c0_71] : memref<23x128xf32, #tpu.memory_space<vmem>>, vector<16x128xf32>
    %72 = arith.truncf %71 : vector<16x128xf32> to vector<16x128xbf16>
    %c0_72 = arith.constant 0 : index
    %c0_73 = arith.constant 0 : index
    %73 = vector.load %arg21[%c0_72, %c0_73] : memref<16x1024xbf16, #tpu.memory_space<vmem>>, vector<16x128xbf16>
    tpu.vector_store %arg21[%c0_72, %c0_73], %72 {strides = array<i32>} : memref<16x1024xbf16, #tpu.memory_space<vmem>>, vector<16x128xbf16>,
    %c3_74 = arith.constant 3 : index
    %c0_75 = arith.constant 0 : index
    %74 = vector.load %arg20[%c3_74, %c0_75] : memref<23x128xf32, #tpu.memory_space<vmem>>, vector<16x128xf32>
    %75 = arith.truncf %74 : vector<16x128xf32> to vector<16x128xbf16>
    %c0_76 = arith.constant 0 : index
    %c128_77 = arith.constant 128 : index
    %76 = vector.load %arg21[%c0_76, %c128_77] : memref<16x1024xbf16, #tpu.memory_space<vmem>>, vector<16x128xbf16>
    tpu.vector_store %arg21[%c0_76, %c128_77], %75 {strides = array<i32>} : memref<16x1024xbf16, #tpu.memory_space<vmem>>, vector<16x128xbf16>,
    %c4_78 = arith.constant 4 : index
    %c0_79 = arith.constant 0 : index
    %77 = vector.load %arg20[%c4_78, %c0_79] : memref<23x128xf32, #tpu.memory_space<vmem>>, vector<16x128xf32>
    %78 = arith.truncf %77 : vector<16x128xf32> to vector<16x128xbf16>
    %c0_80 = arith.constant 0 : index
    %c256_81 = arith.constant 256 : index
    %79 = vector.load %arg21[%c0_80, %c256_81] : memref<16x1024xbf16, #tpu.memory_space<vmem>>, vector<16x128xbf16>
    tpu.vector_store %arg21[%c0_80, %c256_81], %78 {strides = array<i32>} : memref<16x1024xbf16, #tpu.memory_space<vmem>>, vector<16x128xbf16>,
    %c0_82 = arith.constant 0 : index
    %c0_83 = arith.constant 0 : index
    %80 = vector.load %arg21[%c0_82, %c0_83] : memref<16x1024xbf16, #tpu.memory_space<vmem>>, vector<16x384xbf16>
    %c0_84 = arith.constant 0 : index
    %c0_85 = arith.constant 0 : index
    %81 = vector.load %arg8[%c0_84, %c0_85] : memref<384x128xbf16, #tpu.memory_space<vmem>>, vector<384x128xbf16>
    %cst_86 = arith.constant dense<0.000000e+00> : vector<16x128xf32>
    %82 = tpu.matmul %80, %81, %cst_86 {dimension_numbers = #tpu.dot_dimension_numbers<[1], [0], [0], [1], [0, 0, 1, 1], [], []>} : vector<16x384xbf16>, vector<384x128xbf16>, vector<16x128xf32> -> vector<16x128xf32>
    %c0_87 = arith.constant 0 : index
    %c0_88 = arith.constant 0 : index
    %83 = vector.load %arg9[%c0_87, %c0_88] : memref<1x128xf32, #tpu.memory_space<vmem>>, vector<1x128xf32>
    %84 = vector.broadcast %83 : vector<1x128xf32> to vector<16x128xf32>
    %85 = arith.mulf %82, %84 : vector<16x128xf32>
    %c0_89 = arith.constant 0 : index
    %c0_90 = arith.constant 0 : index
    %86 = vector.load %arg10[%c0_89, %c0_90] : memref<1x128xf32, #tpu.memory_space<vmem>>, vector<1x128xf32>
    %87 = vector.broadcast %86 : vector<1x128xf32> to vector<16x128xf32>
    %88 = arith.addf %85, %87 : vector<16x128xf32>
    %cst_91 = arith.constant 0.000000e+00 : f32
    %89 = vector.broadcast %cst_91 : f32 to vector<16x128xf32>
    %90 = arith.maximumf %88, %89 : vector<16x128xf32>
    %cst_92 = arith.constant dense<0.000000e+00> : vector<128xf32>
    %91 = vector.multi_reduction <add>, %90, %cst_92 [0] : vector<16x128xf32> to vector<128xf32>
    %92 = vector.shape_cast %91 : vector<128xf32> to vector<1x128xf32>
    %cst_93 = arith.constant 6.250000e-02 : f32
    %93 = vector.broadcast %cst_93 : f32 to vector<1x128xf32>
    %94 = arith.mulf %92, %93 : vector<1x128xf32>
    %cst_94 = arith.constant dense<0xFF800000> : vector<128xf32>
    %95 = vector.multi_reduction <maximumf>, %90, %cst_94 [0] : vector<16x128xf32> to vector<128xf32>
    %96 = vector.shape_cast %95 : vector<128xf32> to vector<1x128xf32>
    %97 = tpu.concatenate %94, %96 in 1 : vector<1x128xf32>, vector<1x128xf32> -> vector<1x256xf32>
    %c0_95 = arith.constant 0 : index
    %c0_96 = arith.constant 0 : index
    %98 = vector.load %arg11[%c0_95, %c0_96] : memref<1x256xf32, #tpu.memory_space<vmem>>, vector<1x256xf32>
    %99 = arith.mulf %97, %98 : vector<1x256xf32>
    %c0_97 = arith.constant 0 : index
    %c0_98 = arith.constant 0 : index
    %100 = vector.load %arg12[%c0_97, %c0_98] : memref<1x256xf32, #tpu.memory_space<vmem>>, vector<1x256xf32>
    %101 = arith.addf %99, %100 : vector<1x256xf32>
    %102 = arith.truncf %101 : vector<1x256xf32> to vector<1x256xbf16>
    %c0_99 = arith.constant 0 : index
    %c0_100 = arith.constant 0 : index
    %103 = vector.load %arg13[%c0_99, %c0_100] : memref<256x128xbf16, #tpu.memory_space<vmem>>, vector<256x128xbf16>
    %cst_101 = arith.constant dense<0.000000e+00> : vector<1x128xf32>
    %104 = tpu.matmul %102, %103, %cst_101 {dimension_numbers = #tpu.dot_dimension_numbers<[1], [0], [0], [1], [0, 0, 1, 1], [], []>} : vector<1x256xbf16>, vector<256x128xbf16>, vector<1x128xf32> -> vector<1x128xf32>
    %c0_102 = arith.constant 0 : index
    %c0_103 = arith.constant 0 : index
    %105 = vector.load %arg14[%c0_102, %c0_103] : memref<1x128xf32, #tpu.memory_space<vmem>>, vector<1x128xf32>
    %106 = arith.addf %104, %105 : vector<1x128xf32>
    %cst_104 = arith.constant 0.000000e+00 : f32
    %107 = vector.broadcast %cst_104 : f32 to vector<1x128xf32>
    %108 = arith.maximumf %106, %107 : vector<1x128xf32>
    %c0_105 = arith.constant 0 : index
    %c0_106 = arith.constant 0 : index
    %109 = vector.load %arg15[%c0_105, %c0_106] : memref<1x128xf32, #tpu.memory_space<vmem>>, vector<1x128xf32>
    %110 = arith.mulf %108, %109 : vector<1x128xf32>
    %c0_107 = arith.constant 0 : index
    %c0_108 = arith.constant 0 : index
    %111 = vector.load %arg16[%c0_107, %c0_108] : memref<1x128xf32, #tpu.memory_space<vmem>>, vector<1x128xf32>
    %112 = arith.addf %110, %111 : vector<1x128xf32>
    %113 = arith.truncf %112 : vector<1x128xf32> to vector<1x128xbf16>
    %c0_109 = arith.constant 0 : index
    %c0_110 = arith.constant 0 : index
    %114 = vector.load %arg17[%c0_109, %c0_110] : memref<128x128xbf16, #tpu.memory_space<vmem>>, vector<128x128xbf16>
    %cst_111 = arith.constant dense<0.000000e+00> : vector<1x128xf32>
    %115 = tpu.matmul %113, %114, %cst_111 {dimension_numbers = #tpu.dot_dimension_numbers<[1], [0], [0], [1], [0, 0, 1, 1], [], []>} : vector<1x128xbf16>, vector<128x128xbf16>, vector<1x128xf32> -> vector<1x128xf32>
    %c0_112 = arith.constant 0 : index
    %c0_113 = arith.constant 0 : index
    %116 = vector.load %arg18[%c0_112, %c0_113] : memref<1x128xf32, #tpu.memory_space<vmem>>, vector<1x128xf32>
    %117 = arith.addf %115, %116 : vector<1x128xf32>
    %c0_114 = arith.constant 0 : index
    %c0_115 = arith.constant 0 : index
    %c0_116 = arith.constant 0 : index
    %118 = vector.load %arg19[%c0_114, %c0_115, %c0_116] : memref<1x1x128xf32, #tpu.memory_space<vmem>>, vector<1x1x128xf32>
    %119 = vector.shape_cast %118 : vector<1x1x128xf32> to vector<1x128xf32>
    %120 = vector.shape_cast %117 : vector<1x128xf32> to vector<1x1x128xf32>
    tpu.vector_store %arg19[%c0_114, %c0_115, %c0_116], %120 {strides = array<i32>} : memref<1x1x128xf32, #tpu.memory_space<vmem>>, vector<1x1x128xf32>,
    return
  }
  func.func @transform_0(%arg0: i32) -> (i32, i32, i32) {
    %c0_i32 = arith.constant 0 : i32
    %c0_i32_0 = arith.constant 0 : i32
    %c0_i32_1 = arith.constant 0 : i32
    return %arg0, %c0_i32, %c0_i32_0 : i32, i32, i32
  }
  func.func @transform_1(%arg0: i32) -> (i32, i32) {
    %c0_i32 = arith.constant 0 : i32
    %c0_i32_0 = arith.constant 0 : i32
    %c0_i32_1 = arith.constant 0 : i32
    return %c0_i32, %c0_i32_0 : i32, i32
  }
  func.func @transform_2(%arg0: i32) -> (i32, i32) {
    %c0_i32 = arith.constant 0 : i32
    %c0_i32_0 = arith.constant 0 : i32
    %c0_i32_1 = arith.constant 0 : i32
    return %c0_i32, %c0_i32_0 : i32, i32
  }
  func.func @transform_3(%arg0: i32) -> (i32, i32) {
    %c0_i32 = arith.constant 0 : i32
    %c0_i32_0 = arith.constant 0 : i32
    %c0_i32_1 = arith.constant 0 : i32
    return %c0_i32, %c0_i32_0 : i32, i32
  }
  func.func @transform_4(%arg0: i32) -> (i32, i32) {
    %c0_i32 = arith.constant 0 : i32
    %c0_i32_0 = arith.constant 0 : i32
    %c0_i32_1 = arith.constant 0 : i32
    return %c0_i32, %c0_i32_0 : i32, i32
  }
  func.func @transform_5(%arg0: i32) -> (i32, i32) {
    %c0_i32 = arith.constant 0 : i32
    %c0_i32_0 = arith.constant 0 : i32
    %c0_i32_1 = arith.constant 0 : i32
    return %c0_i32, %c0_i32_0 : i32, i32
  }
  func.func @transform_6(%arg0: i32) -> (i32, i32) {
    %c0_i32 = arith.constant 0 : i32
    %c0_i32_0 = arith.constant 0 : i32
    %c0_i32_1 = arith.constant 0 : i32
    return %c0_i32, %c0_i32_0 : i32, i32
  }
  func.func @transform_7(%arg0: i32) -> (i32, i32) {
    %c0_i32 = arith.constant 0 : i32
    %c0_i32_0 = arith.constant 0 : i32
    %c0_i32_1 = arith.constant 0 : i32
    return %c0_i32, %c0_i32_0 : i32, i32
  }
  func.func @transform_8(%arg0: i32) -> (i32, i32) {
    %c0_i32 = arith.constant 0 : i32
    %c0_i32_0 = arith.constant 0 : i32
    %c0_i32_1 = arith.constant 0 : i32
    return %c0_i32, %c0_i32_0 : i32, i32
  }
  func.func @transform_9(%arg0: i32) -> (i32, i32) {
    %c0_i32 = arith.constant 0 : i32
    %c0_i32_0 = arith.constant 0 : i32
    %c0_i32_1 = arith.constant 0 : i32
    return %c0_i32, %c0_i32_0 : i32, i32
  }
  func.func @transform_10(%arg0: i32) -> (i32, i32) {
    %c0_i32 = arith.constant 0 : i32
    %c0_i32_0 = arith.constant 0 : i32
    %c0_i32_1 = arith.constant 0 : i32
    return %c0_i32, %c0_i32_0 : i32, i32
  }
  func.func @transform_11(%arg0: i32) -> (i32, i32) {
    %c0_i32 = arith.constant 0 : i32
    %c0_i32_0 = arith.constant 0 : i32
    %c0_i32_1 = arith.constant 0 : i32
    return %c0_i32, %c0_i32_0 : i32, i32
  }
  func.func @transform_12(%arg0: i32) -> (i32, i32) {
    %c0_i32 = arith.constant 0 : i32
    %c0_i32_0 = arith.constant 0 : i32
    %c0_i32_1 = arith.constant 0 : i32
    return %c0_i32, %c0_i32_0 : i32, i32
  }
  func.func @transform_13(%arg0: i32) -> (i32, i32) {
    %c0_i32 = arith.constant 0 : i32
    %c0_i32_0 = arith.constant 0 : i32
    %c0_i32_1 = arith.constant 0 : i32
    return %c0_i32, %c0_i32_0 : i32, i32
  }
  func.func @transform_14(%arg0: i32) -> (i32, i32) {
    %c0_i32 = arith.constant 0 : i32
    %c0_i32_0 = arith.constant 0 : i32
    %c0_i32_1 = arith.constant 0 : i32
    return %c0_i32, %c0_i32_0 : i32, i32
  }
  func.func @transform_15(%arg0: i32) -> (i32, i32) {
    %c0_i32 = arith.constant 0 : i32
    %c0_i32_0 = arith.constant 0 : i32
    %c0_i32_1 = arith.constant 0 : i32
    return %c0_i32, %c0_i32_0 : i32, i32
  }
  func.func @transform_16(%arg0: i32) -> (i32, i32) {
    %c0_i32 = arith.constant 0 : i32
    %c0_i32_0 = arith.constant 0 : i32
    %c0_i32_1 = arith.constant 0 : i32
    return %c0_i32, %c0_i32_0 : i32, i32
  }
  func.func @transform_17(%arg0: i32) -> (i32, i32) {
    %c0_i32 = arith.constant 0 : i32
    %c0_i32_0 = arith.constant 0 : i32
    %c0_i32_1 = arith.constant 0 : i32
    return %c0_i32, %c0_i32_0 : i32, i32
  }
  func.func @transform_18(%arg0: i32) -> (i32, i32, i32) {
    %c0_i32 = arith.constant 0 : i32
    %c0_i32_0 = arith.constant 0 : i32
    %c0_i32_1 = arith.constant 0 : i32
    return %arg0, %c0_i32, %c0_i32_0 : i32, i32, i32
  }
}

</mosaic_0001>

<bundles_post_ra>
// kernel: tpu_custom_call.1
= control target key start
LH: loop header
LB: loop body
LE: loop exit
PB: predicated region body
PF: predicated region fallthrough
CT: control target
= control target key end

     0   :  { %s4112_s0 = inlined_call_operand.hbm [shape: bf16[2,16,128], index: 0, kind: input, shape index: {}]   ;;  %s4113_s1 = inlined_call_operand.hbm [shape: bf16[1024,128], index: 1, kind: input, shape index: {}]   ;;  %s4114_s2 = inlined_call_operand.vmem [shape: f32[1,128], index: 2, kind: input, shape index: {}]   ;;  %s4115_s3 = inlined_call_operand.vmem [shape: f32[1,128], index: 3, kind: input, shape index: {}]   ;;  %s4116_s4 = inlined_call_operand.hbm [shape: bf16[640,128], index: 4, kind: input, shape index: {}]   ;;  %s4117_s5 = inlined_call_operand.vmem [shape: f32[1,128], index: 5, kind: input, shape index: {}]   ;;  %s4118_s6 = inlined_call_operand.vmem [shape: f32[1,128], index: 6, kind: input, shape index: {}]   ;;  %s4119_s7 = inlined_call_operand.hbm [shape: bf16[384,128], index: 7, kind: input, shape index: {}]   ;;  %s4120_s8 = inlined_call_operand.vmem [shape: f32[1,128], index: 8, kind: input, shape index: {}]   ;;  %s4121_s9 = inlined_call_operand.vmem [shape: f32[1,128], index: 9, kind: input, shape index: {}]   ;;  %s4122_s10 = inlined_call_operand.vmem [shape: f32[1,256], index: 10, kind: input, shape index: {}]   ;;  %s4123_s11 = inlined_call_operand.vmem [shape: f32[1,256], index: 11, kind: input, shape index: {}]   ;;  %s4124_s12 = inlined_call_operand.hbm [shape: bf16[256,128], index: 12, kind: input, shape index: {}]   ;;  %s4125_s13 = inlined_call_operand.vmem [shape: f32[1,128], index: 13, kind: input, shape index: {}]   ;;  %s4126_s14 = inlined_call_operand.vmem [shape: f32[1,128], index: 14, kind: input, shape index: {}]   ;;  %s4127_s15 = inlined_call_operand.vmem [shape: f32[1,128], index: 15, kind: input, shape index: {}]   ;;  %s4128_s16 = inlined_call_operand.hbm [shape: bf16[128,128], index: 16, kind: input, shape index: {}]   ;;  %s4129_s17 = inlined_call_operand.vmem [shape: f32[1,128], index: 17, kind: input, shape index: {}]   ;;  %s4130_s18 = inlined_call_operand.hbm [shape: f32[2,1,128], index: 18, kind: output, shape index: {}]  }
   0x1   :  { %4140 = sst [smem:[#allocation21_spill]] %s4112_s0 }
   0x2   :  { %4141 = sst [smem:[#allocation22_spill]] %s4113_s1 }
   0x3   :  { %4142 = sst [smem:[#allocation23_spill]] %s4114_s2 }
   0x4   :  { %4143 = sst [smem:[#allocation24_spill]] %s4121_s9 }
   0x5   :  { %4144 = sst [smem:[#allocation25_spill]] %s4122_s10 }
   0x6   :  { %4145 = sst [smem:[#allocation26_spill]] %s4123_s11 }
   0x7   :  { %4146 = sst [smem:[#allocation27_spill]] %s4125_s13 }
   0x8   :  { %4147 = sst [smem:[#allocation28_spill]] %s4126_s14 }
   0x9   :  { %4148 = sst [smem:[#allocation29_spill]] %s4127_s15 }
   0xa   :  { %4149 = sst [smem:[#allocation30_spill]] %s4129_s17 }
   0xb   :  { %4150 = sst [smem:[#allocation31_spill]] %s4130_s18 }
   0xc   :  { %23 = vsyncpa [#allocation5], 0 }
   0xd   :  { %25 = vsyncpa [#allocation5 + $0x1], 0 }
   0xe   :  { %26 = vsyncpa [#allocation8], 0 }
   0xf   :  { %27 = vsyncpa [#allocation11], 0 }
  0x10   :  { %28 = vsyncpa [#allocation14], 0 }
  0x11   :  { %29 = vsyncpa [#allocation6], 0 }
  0x12   :  { %31 = vsyncpa [#allocation6 + $0x1], 0  ;;  %s3722_s27 = smov 0   ;;  %s3724_s28 = smov 0  }
  0x13   :  { %s3726_s29 = smov 0   ;;  %s3728_s30 = smov 0  }
  0x14 LB: > { %s3616_s0 = smov [#allocation7]   ;;  %s3743_s1 = sadd.s32 4294967295, %s3614_s30   ;;  %s3614_s30 = sphi %s3728_s30, %s4185_s30   ;;  %s3610_s29 = sphi %s3726_s29, %s4184_s29   ;;  %s3606_s28 = sphi %s3724_s28, %s4183_s28   ;;  %s3602_s27 = sphi %s3722_s27, %s4182_s27  }
  0x15   : > { %s463_s19 = sshll.u32 %s3616_s0, 4  ;;  %p2666_p0 = scmp.ge.s32.totalorder %s3614_s30, 1  ;;  %s3748_s19 = int_to_ptr.vmem [resolvable:$true] %s463_s19 }
  0x16   : > { %p4135_p1 = scmp.eq.s32.totalorder %s3743_s1, 0  ;;  %p451_p2 = scmp.lt.s32.totalorder %s3614_s30, 3 }
  0x17   : > { %s3617_s21 = smov [#allocation10]   ;;  %s3618_s23 = smov [#allocation9]  }
  0x18   : > { %p3750_p3 = pnand %p2666_p0, %p451_p2  ;;  %s501_s22 = sshll.u32 %s3617_s21, 4  ;;  %s3763_s22 = int_to_ptr.vmem [resolvable:$true] %s501_s22 }
  0x19   : > { %s482_s24 = sshll.u32 %s3618_s23, 4  ;;  %s4153_s0 = sld [smem:[#allocation22_spill]]  ;;  %s3765_s24 = int_to_ptr.vmem [resolvable:$true] %s482_s24 }
  0x1a   : > { %s4151_s20 = scalar_select %p3750_p3, 1, 0 }
  0x1b   : > { %p3136_p5 = pneg %p3750_p3 }
  0x1d   : > { %p3759_p6 = pnand %p3136_p5, %p4135_p1 }
  0x1f   : > { %s3366_s18 = scalar_lea.hbm %s4153_s0, 8192  ;;  %p3775_p8 = pneg %p3759_p6 }
  0x20   : > { %p3367_p7 = scmp.ne.s32.totalorder %s4153_s0, %s3366_s18  ;;  %p3373_p11 = scmp.lt.u32.totalorder %s3366_s18, %s4153_s0 }
  0x22   : > { %p3369_p9 = pnand %p3775_p8, %p3367_p7 }
  0x24   : > { %p3370_p10 = pneg %p3369_p9 }
  0x26   : > { %p3375_p12 = pnand %p3373_p11, %p3370_p10 }
  0x28   : > { %3378 = shalt.err (!%p3375_p12)
}
  0x29   : > { %s3379_s15 = scalar_lea.vmem %s3748_s19, 8192  ;;  %p3387_p5 = scmp.lt.s32.totalorder %s3748_s19, %s3748_s19 }
  0x2a   : > { %p3380_p13 = scmp.ne.s32.totalorder %s3748_s19, %s3379_s15  ;;  %p3388_p4 = scmp.lt.s32.totalorder %s3379_s15, %s3379_s15 }
  0x2c   : > { %p3382_p0 = pnand %p3380_p13, %p3775_p8  ;;  %p3389_p7 = por %p3388_p4, %p3387_p5 }
  0x2e   : > { %p3383_p2 = pneg %p3382_p0 }
  0x30   : > { %p3390_p9 = pnand %p3389_p7, %p3383_p2 }
  0x32   : > { %3393 = shalt.err (!%p3390_p9)
}
  0x33   : > { %s4137_s17 = smov 64   ;;  %s4138_s14 = smov 4  }
  0x34   : > { %3139 = dma.hbm_to_vmem [thread:$0]  (!%p3759_p6), %s4153_s0, 8192, %s3748_s19, [#allocation8], %s4137_s17, %s4137_s17, %s4138_s14  }
  0x35   : > { %s3394_s15 = scalar_lea.hbm %s4119_s7, 3072 }
  0x36   : > { %p3395_p4 = scmp.ne.s32.totalorder %s4119_s7, %s3394_s15  ;;  %p3401_p12 = scmp.lt.u32.totalorder %s3394_s15, %s4119_s7 }
  0x38   : > { %p3397_p10 = pnand %p3395_p4, %p3775_p8 }
  0x3a   : > { %p3398_p11 = pneg %p3397_p10 }
  0x3c   : > { %p3403_p13 = pnand %p3401_p12, %p3398_p11 }
  0x3e   : > { %3406 = shalt.err (!%p3403_p13)
}
  0x3f   : > { %s3407_s19 = scalar_lea.vmem %s3763_s22, 3072  ;;  %p3415_p7 = scmp.lt.s32.totalorder %s3763_s22, %s3763_s22 }
  0x40   : > { %p3408_p0 = scmp.ne.s32.totalorder %s3763_s22, %s3407_s19  ;;  %p3416_p9 = scmp.lt.s32.totalorder %s3407_s19, %s3407_s19 }
  0x42   : > { %p3410_p2 = pnand %p3408_p0, %p3775_p8  ;;  %p3417_p4 = por %p3416_p9, %p3415_p7 }
  0x44   : > { %p3411_p5 = pneg %p3410_p2 }
  0x46   : > { %p3418_p10 = pnand %p3417_p4, %p3411_p5 }
  0x48   : > { %3421 = shalt.err (!%p3418_p10)
}
  0x49   : > { %3145 = dma.hbm_to_vmem [thread:$0]  (!%p3759_p6), %s4119_s7, 3072, %s3763_s22, [#allocation11], %s4137_s17, %s4137_s17, %s4138_s14  }
  0x4a   : > { %s3422_s18 = scalar_lea.hbm %s4116_s4, 5120 }
  0x4b   : > { %p3423_p11 = scmp.ne.s32.totalorder %s4116_s4, %s3422_s18  ;;  %p3429_p0 = scmp.lt.u32.totalorder %s3422_s18, %s4116_s4 }
  0x4d   : > { %p3425_p12 = pnand %p3423_p11, %p3775_p8 }
  0x4f   : > { %p3426_p13 = pneg %p3425_p12 }
  0x51   : > { %p3431_p2 = pnand %p3429_p0, %p3426_p13 }
  0x53   : > { %3434 = shalt.err (!%p3431_p2)
}
  0x54   : > { %s3435_s22 = scalar_lea.vmem %s3765_s24, 5120  ;;  %p3443_p4 = scmp.lt.s32.totalorder %s3765_s24, %s3765_s24 }
  0x55   : > { %p3436_p5 = scmp.ne.s32.totalorder %s3765_s24, %s3435_s22  ;;  %p3444_p10 = scmp.lt.s32.totalorder %s3435_s22, %s3435_s22 }
  0x57   : > { %p3438_p7 = pnand %p3436_p5, %p3775_p8  ;;  %p3445_p11 = por %p3444_p10, %p3443_p4 }
  0x59   : > { %p3439_p9 = pneg %p3438_p7 }
  0x5b   : > { %p3446_p12 = pnand %p3445_p11, %p3439_p9 }
  0x5d   : > { %3449 = shalt.err (!%p3446_p12)
}
  0x5e   : > { %3142 = dma.hbm_to_vmem [thread:$0]  (!%p3759_p6), %s4116_s4, 5120, %s3765_s24, [#allocation8], %s4137_s17, %s4137_s17, %s4138_s14  }
  0x5f   : > { %s3621_s10 = smov [#allocation12]   ;;  %s3622_s13 = smov [#allocation13]  }
  0x60   : > { %s526_s11 = sshll.u32 %s3621_s10, 4  ;;  %s548_s18 = sshll.u32 %s3622_s13, 4  ;;  %s527_s11 = int_to_ptr.vmem [resolvable:$true] %s526_s11  ;;  %s549_s18 = int_to_ptr.vmem [resolvable:$true] %s548_s18 }
  0x61   : > { %s3450_s23 = scalar_lea.hbm %s4124_s12, 2048 }
  0x62   : > { %p3451_p13 = scmp.ne.s32.totalorder %s4124_s12, %s3450_s23  ;;  %p3457_p5 = scmp.lt.u32.totalorder %s3450_s23, %s4124_s12 }
  0x64   : > { %p3453_p0 = pnand %p3451_p13, %p3775_p8 }
  0x66   : > { %p3454_p2 = pneg %p3453_p0 }
  0x68   : > { %p3459_p7 = pnand %p3457_p5, %p3454_p2 }
  0x6a   : > { %3462 = shalt.err (!%p3459_p7)
}
  0x6b   : > { %s3463_s24 = scalar_lea.vmem %s527_s11, 2048  ;;  %p3471_p11 = scmp.lt.s32.totalorder %s527_s11, %s527_s11 }
  0x6c   : > { %p3464_p9 = scmp.ne.s32.totalorder %s527_s11, %s3463_s24  ;;  %p3472_p12 = scmp.lt.s32.totalorder %s3463_s24, %s3463_s24 }
  0x6e   : > { %p3466_p4 = pnand %p3464_p9, %p3775_p8  ;;  %p3473_p1 = por %p3472_p12, %p3471_p11 }
  0x70   : > { %p3467_p10 = pneg %p3466_p4 }
  0x72   : > { %p3474_p3 = pnand %p3473_p1, %p3467_p10 }
  0x74   : > { %3477 = shalt.err (!%p3474_p3)
}
  0x75   : > { %3148 = dma.hbm_to_vmem [thread:$0]  (!%p3759_p6), %s4124_s12, 2048, %s527_s11, [#allocation11], %s4137_s17, %s4137_s17, %s4138_s14  }
  0x76   : > { %s3478_s25 = scalar_lea.hbm %s4128_s16, 1024 }
  0x77   : > { %p3479_p1 = scmp.ne.s32.totalorder %s4128_s16, %s3478_s25  ;;  %p3485_p0 = scmp.lt.u32.totalorder %s3478_s25, %s4128_s16 }
  0x79   : > { %p3481_p3 = pnand %p3479_p1, %p3775_p8 }
  0x7b   : > { %p3482_p13 = pneg %p3481_p3 }
  0x7d   : > { %p3487_p2 = pnand %p3485_p0, %p3482_p13 }
  0x7f   : > { %3490 = shalt.err (!%p3487_p2)
}
  0x80   : > { %s3491_s19 = scalar_lea.vmem %s549_s18, 1024  ;;  %p3499_p4 = scmp.lt.s32.totalorder %s549_s18, %s549_s18 }
  0x81   : > { %p3492_p5 = scmp.ne.s32.totalorder %s549_s18, %s3491_s19  ;;  %p3500_p10 = scmp.lt.s32.totalorder %s3491_s19, %s3491_s19 }
  0x83   : > { %p3494_p7 = pnand %p3492_p5, %p3775_p8  ;;  %p3501_p11 = por %p3500_p10, %p3499_p4 }
  0x85   : > { %p3495_p9 = pneg %p3494_p7 }
  0x87   : > { %p3502_p12 = pnand %p3501_p11, %p3495_p9 }
  0x89   : > { %3505 = shalt.err (!%p3502_p12)
}
  0x8a   : > { %3151 = dma.hbm_to_vmem [thread:$0]  (!%p3759_p6), %s4128_s16, 1024, %s549_s18, [#allocation14], %s4137_s17, %s4137_s17, %s4138_s14  }
  0x8b   : > { %s2665_s2 = sadd.s32 4294967294, %s3614_s30   ;;  %s3895_s21 = sadd.s32 1, %s3614_s30  }
  0x8c   : > { %s44_s0 = sadd.s32 1, %s3610_s29  ;;  %s41_s9 = ssub.s32 %s3614_s30, %s3895_s21 }
  0x8d   : > { %p51_p8 = scmp.ne.s32.totalorder %s3610_s29, %s3606_s28  ;;  %p42_p1 = scmp.eq.s32.totalorder %s41_s9, 0 }
  0x8e   : > { %p52_p3 = scmp.eq.s32.totalorder %s3614_s30, 0  ;;  %p57_p13 = scmp.ne.s32.totalorder %s3606_s28, %s3602_s27 }
  0x8f   : > { %p438_p0 = scmp.eq.s32.totalorder %s3743_s1, 1  ;;  %p4155_p5 = scmp.eq.s32.totalorder %s3743_s1, 0 }
  0x90   : > { %s3907_s10 = scalar_select %p42_p1, %s3610_s29, %s44_s0  }
  0x91   : > { %p53_p2 = por %p52_p3, %p51_p8  ;;  %p3911_p7 = por %p4155_p5, %p57_p13 }
  0x92   : > { %p3915_p6 = por %p438_p0, %p51_p8  ;;  %p444_p9 = scmp.eq.s32.totalorder %s2665_s2, 1 }
  0x93   : > { %p3165_p4 = scmp.lt.s32.totalorder %s3614_s30, 2  ;;  %s565_s25 = sand.u32 1, %s3610_s29  }
  0x94   : > { %s4157_s18 = scalar_select %p3915_p6, 1, 0 }
  0x95   : > { %p3921_p10 = por %p444_p9, %p57_p13  ;;  %s2673_s23 = sshll.u32 %s565_s25, 3 }
  0x96   : > { %s2844_s15 = sshll.u32 %s3614_s30, 7  ;;  %s4159_s11 = sld [smem:[#allocation21_spill]] }
  0x97   : > { %s4158_s26 = scalar_select %p3921_p10, 1, 0 }
  0x98   : > { %s569_s0 = scalar_lea.vmem [#allocation4], %s2673_s23  ;;  %p3931_p11 = pnand %p3165_p4, %p53_p2 }
  0x99   : > { %s576_s9 = sshll.u32 %s569_s0, 4  ;;  %s3937_s17 = scalar_lea.sflag [#allocation5], %s565_s25  ;;  %s3935_s9 = int_to_ptr.vmem [resolvable:$true] %s576_s9 }
  0x9a   : > { %p3508_p8 = pneg %p3931_p11 }
  0x9c   : > { %s3929_s24 = scalar_lea.hbm %s4159_s11, %s2844_s15  ;;  %s3511_s22 = scalar_lea.hbm %s4159_s11, 256 }
  0x9d   : > { %s3506_s14 = scalar_lea.hbm %s3929_s24, 128  ;;  %p3512_p13 = scmp.lt.u32.totalorder %s3929_s24, %s4159_s11 }
  0x9e   : > { %p3507_p12 = scmp.ne.s32.totalorder %s3929_s24, %s3506_s14  ;;  %p3513_p0 = scmp.lt.u32.totalorder %s3511_s22, %s3506_s14 }
  0x9f   : > { %p3515_p5 = scmp.lt.u32.totalorder %s3506_s14, %s3929_s24 }
  0xa0   : > { %p3509_p1 = pnand %p3508_p8, %p3507_p12  ;;  %p3514_p2 = por %p3513_p0, %p3512_p13 }
  0xa2   : > { %p3510_p3 = pneg %p3509_p1  ;;  %p3516_p9 = por %p3515_p5, %p3514_p2 }
  0xa4   : > { %p3517_p4 = pnand %p3516_p9, %p3510_p3 }
  0xa6   : > { %3520 = shalt.err (!%p3517_p4)
}
  0xa7   : > { %s3521_s25 = scalar_lea.vmem %s3935_s9, 128  ;;  %s3623_s23 = smov [#allocation4]  }
  0xa8   : > { %p3522_p12 = scmp.ne.s32.totalorder %s3935_s9, %s3521_s25  ;;  %s3526_s15 = sshll.u32 %s3623_s23, 4  ;;  %s3527_s15 = int_to_ptr.vmem [resolvable:$false] %s3526_s15 }
  0xa9   : > { %s3528_s19 = scalar_lea.vmem %s3527_s15, 256  ;;  %p3529_p6 = scmp.lt.s32.totalorder %s3935_s9, %s3527_s15 }
  0xaa   : > { %p3524_p1 = pnand %p3522_p12, %p3508_p8  ;;  %p3530_p13 = scmp.lt.s32.totalorder %s3528_s19, %s3521_s25 }
  0xac   : > { %p3525_p10 = pneg %p3524_p1  ;;  %p3531_p0 = por %p3530_p13, %p3529_p6 }
  0xae   : > { %p3532_p2 = pnand %p3531_p0, %p3525_p10 }
  0xb0   : > { %3535 = shalt.err (!%p3532_p2)
}
  0xb1   : > { %s4161_s14 = smov 4   ;;  %s4162_s22 = smov 64  }
  0xb2   : > { %3155 = dma.hbm_to_vmem [thread:$0]  (!%p3931_p11), %s3929_s24, 128, %s3935_s9, %s3937_s17, %s4162_s22, %s4162_s22, %s4161_s14  }
  0xb3   : > { %p4163_p8 = scmp.ne.s32.totalorder %s4151_s20, 0 }
  0xb4   : > { %s3971_s0 = sand.u32 (!%p4163_p8), 1, %s3606_s28  }
  0xb5   : > { %588 = sbr.rel (%p4163_p8) target bundleno = 1469 (0x5bd), region = 92  ;;  %s2677_s25 = sshll.u32 (!%p4163_p8), %s3971_s0, 3 }
  0xb6   : > { %s591_s23 = scalar_lea.sflag (!%p4163_p8), [#allocation5], %s3971_s0  ;;  %s3975_s15 = scalar_lea.vmem (!%p4163_p8), [#allocation4], %s2677_s25 }
  0xbc   : > { %3581 = dma.done.wait (%p3911_p7), %s591_s23, 128  }
  0xbd   : > { %3583 = vsyncadd (%p3911_p7), %s591_s23, 4294967168  ;;  %p4164_p6 = scmp.eq.s32.totalorder %s3743_s1, 0 }
  0xbf   : > { %3585 = dma.done.wait (%p4164_p6), [#allocation8], 13312   ;;  %p4165_p10 = pmov %p4164_p6 }
  0xc0   : > { %p4166_p11 = pmov %p4164_p6 }
  0xc1   : > { %3587 = vsyncadd (%p4165_p10), [#allocation8], 4294953984 }
  0xc2   : > { %3589 = dma.done.wait (%p4166_p11), [#allocation11], 5120   ;;  %p4167_p3 = pmov %p4164_p6 }
  0xc4   : > { %3591 = vsyncadd (%p4167_p3), [#allocation11], 4294962176  ;;  %p4168_p5 = pmov %p4167_p3 }
  0xc5   : > { %p4169_p9 = pmov %p4167_p3 }
  0xc6   : > { %3593 = dma.done.wait (%p4168_p5), [#allocation14], 1024  }
  0xc7   : > { %3595 = vsyncadd (%p4169_p9), [#allocation14], 4294966272  ;;  %v3624_v0 = vmov 0.0   ;;  %v3213_v1 = vld [vmem:[#allocation7 + $0x40] sm:$0xff]   ;;  %v3217_v5 = vld [vmem:[#allocation7 + $0x48] sm:$0xff]   ;;  %s4170_s13 = sld [smem:[#allocation23_spill]] }
  0xc8   : > { %667 = vst [vmem:[#allocation2] sm:$0x7] %v3624_v0  ;;  %668 = vst [vmem:[#allocation2 + $0x13] sm:$0xf] %v3624_v0  ;;  %v3214_v2 = vld [vmem:[#allocation7 + $0xc0] sm:$0xff]   ;;  %2849 = vmatprep.subr.bf16.mxu0 %v3213_v1  ;;  %v3218_v6 = vld [vmem:[#allocation7 + $0xc8] sm:$0xff]  }
  0xc9   : > { %v3215_v3 = vld [vmem:[#allocation7] sm:$0xff]   ;;  %2871 = vmatprep.subr.bf16.mxu1 %v3214_v2  ;;  %v3219_v7 = vld [vmem:[#allocation7 + $0x8] sm:$0xff]   ;;  %v3221_v9 = vld [vmem:[#allocation7 + $0x50] sm:$0xff]   ;;  %vm3625_vm0 = vmmov 0   ;;  %s4171_s17 = sld [smem:[#allocation24_spill]]  ;;  %s4172_s9 = sld [smem:[#allocation25_spill]] }
  0xca   : > { %v3216_v4 = vld [vmem:[#allocation7 + $0x80] sm:$0xff]   ;;  %2850 = vmatpush3.bf16.msra.mxu0 %v3215_v3  ;;  %v3220_v8 = vld [vmem:[#allocation7 + $0x88] sm:$0xff]   ;;  %v3222_v10 = vld [vmem:[#allocation7 + $0xd0] sm:$0xff]   ;;  %s4173_s14 = sld [smem:[#allocation26_spill]]  ;;  %s4174_s23 = sld [smem:[#allocation27_spill]] }
  0xcb   : > { %2872 = vmatpush3.bf16.msra.mxu1 %v3216_v4  ;;  %2851 = vmatprep.subr.bf16.mxu0 %v3217_v5  ;;  %v3223_v11 = vld [vmem:[#allocation7 + $0x10] sm:$0xff]   ;;  %v3225_v13 = vld [vmem:[#allocation7 + $0x58] sm:$0xff]   ;;  %v3229_v17 = vld [vmem:[#allocation7 + $0x60] sm:$0xff]   ;;  %s2841_s22 = sshll.u32 %s3743_s1, 4  ;;  %s665_s25 = scalar_lea.vmem [#allocation15], %s3971_s0 }
  0xcc   : > { %2873 = vmatprep.subr.bf16.mxu1 %v3218_v6  ;;  %v3224_v12 = vld [vmem:[#allocation7 + $0x90] sm:$0xff]   ;;  %v3226_v14 = vld [vmem:[#allocation7 + $0xd8] sm:$0xff]   ;;  %v3230_v18 = vld [vmem:[#allocation7 + $0xe0] sm:$0xff]   ;;  %s2539_s24 = scalar_lea.sflag [#allocation6], %s3971_s0  ;;  %p4179_p4 = scmp.ne.s32.totalorder %s4157_s18, 0 }
  0xcd   : > { %v3227_v15 = vld [vmem:[#allocation7 + $0x18] sm:$0xff]   ;;  %v3231_v19 = vld [vmem:[#allocation7 + $0x20] sm:$0xff]   ;;  %v3233_v21 = vld [vmem:[#allocation7 + $0x68] sm:$0xff]  }
  0xce   : > { %2852 = vmatpush3.bf16.msra.mxu0 %v3219_v7  ;;  %v3228_v16 = vld [vmem:[#allocation7 + $0x98] sm:$0xff]   ;;  %v3232_v20 = vld [vmem:[#allocation7 + $0xa0] sm:$0xff]   ;;  %v3234_v22 = vld [vmem:[#allocation7 + $0xe8] sm:$0xff]  }
  0xcf   : > { %2874 = vmatpush3.bf16.msra.mxu1 %v3220_v8  ;;  %2853 = vmatprep.subr.bf16.mxu0 %v3221_v9  ;;  %v3235_v23 = vld [vmem:[#allocation7 + $0x28] sm:$0xff]   ;;  %v3237_v25 = vld [vmem:[#allocation7 + $0x70] sm:$0xff]   ;;  %v3241_v29 = vld [vmem:[#allocation7 + $0x78] sm:$0xff]  }
  0xd0   : > { %2875 = vmatprep.subr.bf16.mxu1 %v3222_v10  ;;  %v3236_v24 = vld [vmem:[#allocation7 + $0xa8] sm:$0xff]   ;;  %v3238_v26 = vld [vmem:[#allocation7 + $0xf0] sm:$0xff]   ;;  %v3242_v30 = vld [vmem:[#allocation7 + $0xf8] sm:$0xff]  }
  0xd1   : > { %v3239_v27 = vld [vmem:[#allocation7 + $0x30] sm:$0xff]   ;;  %v3243_v31 = vld [vmem:[#allocation7 + $0x38] sm:$0xff]   ;;  %v3246_v37 = vld [vmem:[#allocation7 + $0x140] sm:$0xff]  }
  0xd2   : > { %2854 = vmatpush3.bf16.msra.mxu0 %v3223_v11  ;;  %v3240_v28 = vld [vmem:[#allocation7 + $0xb0] sm:$0xff]   ;;  %v3244_v32 = vld [vmem:[#allocation7 + $0xb8] sm:$0xff]   ;;  %v3247_v38 = vld [vmem:[#allocation7 + $0x1c0] sm:$0xff]  }
  0xd3   : > { %2876 = vmatpush3.bf16.msra.mxu1 %v3224_v12  ;;  %2855 = vmatprep.subr.bf16.mxu0 %v3225_v13  ;;  %v2846_v33 = vld [vmem:[%s3975_s15] sm:$0xff]   ;;  %v3248_v39 = vld [vmem:[#allocation7 + $0x100] sm:$0xff]   ;;  %v3250_v44 = vld [vmem:[#allocation7 + $0x148] sm:$0xff]  }
  0xd4   : > { %2877 = vmatprep.subr.bf16.mxu1 %v3226_v14  ;;  %v3245_v34 = vld [vmem:[%s3975_s15] sm:$0xff]  ;;  %v2847_v35 = vunpack.c.l.bf16 %v2846_v33  ;;  %v2848_v36 = vunpack.c.h.bf16 %v2846_v33  ;;  %v3249_v40 = vld [vmem:[#allocation7 + $0x180] sm:$0xff]   ;;  %v3251_v51 = vld [vmem:[#allocation7 + $0x1c8] sm:$0xff]  }
  0xd5   : > { %1300 = vmatprep.mubr.bf16.mxu1 %v3245_v34  ;;  %v3252_v52 = vld [vmem:[#allocation7 + $0x108] sm:$0xff]   ;;  %v3254_v54 = vld [vmem:[#allocation7 + $0x150] sm:$0xff]   ;;  %v3258_v58 = vld [vmem:[#allocation7 + $0x158] sm:$0xff]  }
  0xd6   : > { %2856 = vmatpush3.bf16.msra.mxu0 %v3227_v15  ;;  %673 = vst [vmem:[#allocation2 + $0x3] sm:$0xff] %v2847_v35  ;;  %674 = vst [vmem:[#allocation2 + $0xb] sm:$0xff] %v2848_v36  ;;  %v3253_v53 = vld [vmem:[#allocation7 + $0x188] sm:$0xff]   ;;  %v3255_v55 = vld [vmem:[#allocation7 + $0x1d0] sm:$0xff]  }
  0xd7   : > { %2878 = vmatpush3.bf16.msra.mxu1 %v3228_v16  ;;  %2857 = vmatprep.subr.bf16.mxu0 %v3229_v17  ;;  %v3256_v56 = vld [vmem:[#allocation7 + $0x110] sm:$0xff]   ;;  %v3259_v59 = vld [vmem:[#allocation7 + $0x1d8] sm:$0xff]   ;;  %v3262_v62 = vld [vmem:[#allocation7 + $0x160] sm:$0xff]  }
  0xd8   : > { %2879 = vmatprep.subr.bf16.mxu1 %v3230_v18  ;;  %v3257_v57 = vld [vmem:[#allocation7 + $0x190] sm:$0xff]   ;;  %v3260_v60 = vld [vmem:[#allocation7 + $0x118] sm:$0xff]   ;;  %v3263_v63 = vld [vmem:[#allocation7 + $0x1e0] sm:$0xff]  }
  0xd9   : > { %v3261_v61 = vld [vmem:[#allocation7 + $0x198] sm:$0xff]   ;;  %v3264_v1 = vld [vmem:[#allocation7 + $0x120] sm:$0xff]   ;;  %v3266_v3 = vld [vmem:[#allocation7 + $0x168] sm:$0xff]  }
  0xda   : > { %2858 = vmatpush3.bf16.msra.mxu0 %v3231_v19  ;;  %v3265_v2 = vld [vmem:[#allocation7 + $0x1a0] sm:$0xff]   ;;  %v3267_v4 = vld [vmem:[#allocation7 + $0x1e8] sm:$0xff]   ;;  %v3270_v7 = vld [vmem:[#allocation7 + $0x170] sm:$0xff]  }
  0xdb   : > { %2880 = vmatpush3.bf16.msra.mxu1 %v3232_v20  ;;  %2859 = vmatprep.subr.bf16.mxu0 %v3233_v21  ;;  %v3268_v5 = vld [vmem:[#allocation7 + $0x128] sm:$0xff]   ;;  %v3271_v8 = vld [vmem:[#allocation7 + $0x1f0] sm:$0xff]   ;;  %v3274_v15 = vld [vmem:[#allocation7 + $0x178] sm:$0xff]  }
  0xdc   : > { %2881 = vmatprep.subr.bf16.mxu1 %v3234_v22  ;;  %v3269_v6 = vld [vmem:[#allocation7 + $0x1a8] sm:$0xff]   ;;  %v3272_v9 = vld [vmem:[#allocation7 + $0x130] sm:$0xff]   ;;  %v3275_v16 = vld [vmem:[#allocation7 + $0x1f8] sm:$0xff]  }
  0xdd   : > { %v679_v41 = vld [vmem:[#allocation2 + $0x1] sm:$0xff]  ;;  %v680_v42 = vld [vmem:[#allocation2 + $0x9] sm:$0xff]  ;;  %v3273_v10 = vld [vmem:[#allocation7 + $0x1b0] sm:$0xff]  }
  0xde   : > { %2860 = vmatpush3.bf16.msra.mxu0 %v3235_v23  ;;  %v675_v43 = vld [vmem:[#allocation2] sm:$0xff]  ;;  %v681_v45 = vpack.c.bf16 %v680_v42, %v679_v41  ;;  %v676_v46 = vld [vmem:[#allocation2 + $0x8] sm:$0xff]  ;;  %v3283_v33 = vld [vmem:[#allocation9 + $0x8] sm:$0xff]  }
  0xdf   : > { %2882 = vmatpush3.bf16.msra.mxu1 %v3236_v24  ;;  %2861 = vmatprep.subr.bf16.mxu0 %v3237_v25  ;;  %v683_v47 = vld [vmem:[#allocation2 + $0x2] sm:$0xff]  ;;  %v684_v48 = vld [vmem:[#allocation2 + $0xa] sm:$0xff]  ;;  %v677_v49 = vpack.c.bf16 %v676_v46, %v675_v43  ;;  %v3286_v35 = vld [vmem:[#allocation9 + $0x50] sm:$0xff]  }
  0xe0   : > { %2883 = vmatprep.subr.bf16.mxu1 %v3238_v26  ;;  %v685_v50 = vpack.c.bf16 %v684_v48, %v683_v47  ;;  %1259 = vmatprep.mubr.bf16.mxu0 %v681_v45  ;;  %v695_v11 = vld [vmem:[#allocation2 + $0x5] sm:$0xff]  ;;  %v696_v12 = vld [vmem:[#allocation2 + $0xd] sm:$0xff]  ;;  %v3287_v36 = vld [vmem:[#allocation9 + $0x10] sm:$0xff]  }
  0xe1   : > { %v703_v13 = vld [vmem:[#allocation2 + $0x7] sm:$0xff]  ;;  %v704_v14 = vld [vmem:[#allocation2 + $0xf] sm:$0xff]  ;;  %v697_v17 = vpack.c.bf16 %v696_v12, %v695_v11 }
  0xe2   : > { %2862 = vmatpush3.bf16.msra.mxu0 %v3239_v27  ;;  %v705_v18 = vpack.c.bf16 %v704_v14, %v703_v13  ;;  %v3276_v19 = vld [vmem:[#allocation7 + $0x138] sm:$0xff]   ;;  %v692_v22 = vld [vmem:[#allocation2 + $0xc] sm:$0xff] }
  0xe3   : > { %2884 = vmatpush3.bf16.msra.mxu1 %v3240_v28  ;;  %2863 = vmatprep.subr.bf16.mxu0 %v3241_v29  ;;  %v3277_v20 = vld [vmem:[#allocation7 + $0x1b8] sm:$0xff]   ;;  %v700_v24 = vld [vmem:[#allocation2 + $0xe] sm:$0xff] }
  0xe4   : > { %2885 = vmatprep.subr.bf16.mxu1 %v3242_v30  ;;  %v691_v21 = vld [vmem:[#allocation2 + $0x4] sm:$0xff]  ;;  %v3285_v34 = vld [vmem:[#allocation9 + $0x88] sm:$0xff]  }
  0xe5   : > { %v699_v23 = vld [vmem:[#allocation2 + $0x6] sm:$0xff]  ;;  %v693_v25 = vpack.c.bf16 %v692_v22, %v691_v21  ;;  %v3298_v47 = vld [vmem:[#allocation9 + $0x68] sm:$0xff]  }
  0xe6   : > { %2864 = vmatpush3.bf16.msra.mxu0 %v3243_v31  ;;  %v701_v26 = vpack.c.bf16 %v700_v24, %v699_v23  ;;  %v3278_v27 = vld [vmem:[#allocation9 + $0x40] sm:$0xff]   ;;  %v3282_v31 = vld [vmem:[#allocation9 + $0x48] sm:$0xff]   ;;  %v3292_v41 = vld [vmem:[#allocation9 + $0xd8] sm:$0xff]  }
  0xe7   : > { %2886 = vmatpush3.bf16.msra.mxu1 %v3244_v32  ;;  %2893 = vmatprep.subr.bf16.mxu0 %v3246_v37  ;;  %v3279_v28 = vld [vmem:[#allocation9] sm:$0xff]   ;;  %v3284_v32 = vld [vmem:[#allocation9 + $0xc8] sm:$0xff]   ;;  %v3288_v37 = vld [vmem:[#allocation9 + $0xd0] sm:$0xff]  }
  0xe8   : > { %2915 = vmatprep.subr.bf16.mxu1 %v3247_v38  ;;  %v3280_v29 = vld [vmem:[#allocation9 + $0xc0] sm:$0xff]   ;;  %v3289_v38 = vld [vmem:[#allocation9 + $0x90] sm:$0xff]   ;;  %v3293_v42 = vld [vmem:[#allocation9 + $0x98] sm:$0xff]  }
  0xe9   : > { %1260 = vmatmul.mubr.bf16.vlgmr.msra.gmra.mrb[0].mxu0 %v677_v49  ;;  %v3281_v30 = vld [vmem:[#allocation9 + $0x80] sm:$0xff]   ;;  %v3299_v48 = vld [vmem:[#allocation9 + $0x28] sm:$0xff]   ;;  %v2747_v23 = vld [vmem:[%s4170_s13] ss:$0 sm:$0xff] }
  0xea   : > { %1301 = vmatmul.mubr.bf16.vlgmr.msra.gmra.mrb[0].mxu1 %v685_v50  ;;  %2894 = vmatpush3.bf16.msra.mxu0 %v3248_v39  ;;  %v3290_v39 = vld [vmem:[#allocation9 + $0x58] sm:$0xff]   ;;  %v3294_v43 = vld [vmem:[#allocation9 + $0x60] sm:$0xff]   ;;  %v3300_v49 = vld [vmem:[#allocation9 + $0xe8] sm:$0xff]  }
  0xeb   : > { %2916 = vmatpush3.bf16.msra.mxu1 %v3249_v40  ;;  %2895 = vmatprep.subr.bf16.mxu0 %v3250_v44  ;;  %v3291_v40 = vld [vmem:[#allocation9 + $0x18] sm:$0xff]   ;;  %v3295_v44 = vld [vmem:[#allocation9 + $0x20] sm:$0xff]   ;;  %v3301_v50 = vld [vmem:[#allocation9 + $0xa8] sm:$0xff]  }
  0xec   : > { %2917 = vmatprep.subr.bf16.mxu1 %v3251_v51  ;;  %1341 = vmatprep.mubr.bf16.mxu0 %v697_v17  ;;  %v3296_v45 = vld [vmem:[#allocation9 + $0xe0] sm:$0xff]   ;;  %v3302_v51 = vld [vmem:[#allocation9 + $0x70] sm:$0xff]  }
  0xed   : > { %1382 = vmatprep.mubr.bf16.mxu1 %v705_v18  ;;  %v3297_v46 = vld [vmem:[#allocation9 + $0xa0] sm:$0xff]  }
  0xee   : > { %2896 = vmatpush3.bf16.msra.mxu0 %v3252_v52  ;;  %v3303_v52 = vld [vmem:[#allocation9 + $0x30] sm:$0xff]  }
  0xef   : > { %2918 = vmatpush3.bf16.msra.mxu1 %v3253_v53  ;;  %2897 = vmatprep.subr.bf16.mxu0 %v3254_v54  ;;  %v3304_v53 = vld [vmem:[#allocation9 + $0xf0] sm:$0xff]  }
  0xf0   : > { %2919 = vmatprep.subr.bf16.mxu1 %v3255_v55  ;;  %v3305_v54 = vld [vmem:[#allocation9 + $0xb0] sm:$0xff]   ;;  %v3306_v55 = vld [vmem:[#allocation9 + $0x78] sm:$0xff]  }
  0xf2   : > { %2898 = vmatpush3.bf16.msra.mxu0 %v3256_v56  ;;  %v3308_v56 = vld [vmem:[#allocation9 + $0xf8] sm:$0xff]  }
  0xf3   : > { %2920 = vmatpush3.bf16.msra.mxu1 %v3257_v57  ;;  %2899 = vmatprep.subr.bf16.mxu0 %v3258_v58  ;;  %v3307_v57 = vld [vmem:[#allocation9 + $0x38] sm:$0xff]  }
  0xf4   : > { %2921 = vmatprep.subr.bf16.mxu1 %v3259_v59  ;;  %v3309_v58 = vld [vmem:[#allocation9 + $0xb8] sm:$0xff]  }
  0xf6   : > { %2900 = vmatpush3.bf16.msra.mxu0 %v3260_v60 }
  0xf7   : > { %2922 = vmatpush3.bf16.msra.mxu1 %v3261_v61  ;;  %2901 = vmatprep.subr.bf16.mxu0 %v3262_v62 }
  0xf8   : > { %2923 = vmatprep.subr.bf16.mxu1 %v3263_v63 }
  0xfa   : > { %2902 = vmatpush3.bf16.msra.mxu0 %v3264_v1 }
  0xfb   : > { %2924 = vmatpush3.bf16.msra.mxu1 %v3265_v2  ;;  %2903 = vmatprep.subr.bf16.mxu0 %v3266_v3 }
  0xfc   : > { %2925 = vmatprep.subr.bf16.mxu1 %v3267_v4 }
  0xfe   : > { %2904 = vmatpush3.bf16.msra.mxu0 %v3268_v5 }
  0xff   : > { %2926 = vmatpush3.bf16.msra.mxu1 %v3269_v6  ;;  %2905 = vmatprep.subr.bf16.mxu0 %v3270_v7 }
 0x100   : > { %2927 = vmatprep.subr.bf16.mxu1 %v3271_v8 }
 0x102   : > { %2906 = vmatpush3.bf16.msra.mxu0 %v3272_v9 }
 0x103   : > { %2928 = vmatpush3.bf16.msra.mxu1 %v3273_v10  ;;  %2907 = vmatprep.subr.bf16.mxu0 %v3274_v15 }
 0x104   : > { %2929 = vmatprep.subr.bf16.mxu1 %v3275_v16 }
 0x106   : > { %2908 = vmatpush3.bf16.msra.mxu0 %v3276_v19 }
 0x107   : > { %2930 = vmatpush3.bf16.msra.mxu1 %v3277_v20  ;;  %2937 = vmatprep.subr.bf16.mxu0 %v3278_v27 }
 0x108   : > { %2959 = vmatprep.subr.bf16.mxu1 %v3280_v29 }
 0x109   : > { %1342 = vmatmul.mubr.bf16.vlgmr.msra.gmra.mrb[4].mxu0 %v693_v25 }
 0x10a   : > { %1383 = vmatmul.mubr.bf16.vlgmr.msra.gmra.mrb[4].mxu1 %v701_v26  ;;  %2938 = vmatpush3.bf16.msra.mxu0 %v3279_v28  ;;  %v2748_v26 = vld [vmem:[%s4115_s3] ss:$0 sm:$0xff] }
 0x10b   : > { %2960 = vmatpush3.bf16.msra.mxu1 %v3281_v30  ;;  %2939 = vmatprep.subr.bf16.mxu0 %v3282_v31 }
 0x10c   : > { %2961 = vmatprep.subr.bf16.mxu1 %v3284_v32 }
 0x10e   : > { %2940 = vmatpush3.bf16.msra.mxu0 %v3283_v33 }
 0x10f   : > { %2962 = vmatpush3.bf16.msra.mxu1 %v3285_v34  ;;  %2941 = vmatprep.subr.bf16.mxu0 %v3286_v35 }
 0x110   : > { %2963 = vmatprep.subr.bf16.mxu1 %v3288_v37 }
 0x112   : > { %2942 = vmatpush3.bf16.msra.mxu0 %v3287_v36 }
 0x113   : > { %2964 = vmatpush3.bf16.msra.mxu1 %v3289_v38  ;;  %2943 = vmatprep.subr.bf16.mxu0 %v3290_v39 }
 0x114   : > { %2965 = vmatprep.subr.bf16.mxu1 %v3292_v41 }
 0x116   : > { %2944 = vmatpush3.bf16.msra.mxu0 %v3291_v40 }
 0x117   : > { %2966 = vmatpush3.bf16.msra.mxu1 %v3293_v42  ;;  %2945 = vmatprep.subr.bf16.mxu0 %v3294_v43  ;;  %v3310_v43 = vld [vmem:[#allocation9 + $0x100] sm:$0xff]  }
 0x118   : > { %2967 = vmatprep.subr.bf16.mxu1 %v3296_v45  ;;  %v3311_v45 = vld [vmem:[#allocation9 + $0x108] sm:$0xff]  }
 0x11a   : > { %2946 = vmatpush3.bf16.msra.mxu0 %v3295_v44 }
 0x11b   : > { %2968 = vmatpush3.bf16.msra.mxu1 %v3297_v46  ;;  %2947 = vmatprep.subr.bf16.mxu0 %v3298_v47  ;;  %v3312_v46 = vld [vmem:[#allocation9 + $0x110] sm:$0xff]   ;;  %v3313_v47 = vld [vmem:[#allocation9 + $0x118] sm:$0xff]  }
 0x11c   : > { %2969 = vmatprep.subr.bf16.mxu1 %v3300_v49  ;;  %v3315_v49 = vld [vmem:[#allocation9 + $0x128] sm:$0xff]  }
 0x11e   : > { %2948 = vmatpush3.bf16.msra.mxu0 %v3299_v48  ;;  %v3314_v48 = vld [vmem:[#allocation9 + $0x120] sm:$0xff]  }
 0x11f   : > { %2970 = vmatpush3.bf16.msra.mxu1 %v3301_v50  ;;  %2949 = vmatprep.subr.bf16.mxu0 %v3302_v51  ;;  %v3316_v50 = vld [vmem:[#allocation9 + $0x130] sm:$0xff]   ;;  %v3317_v51 = vld [vmem:[#allocation9 + $0x138] sm:$0xff]  }
 0x120   : > { %2971 = vmatprep.subr.bf16.mxu1 %v3304_v53 }
 0x122   : > { %2950 = vmatpush3.bf16.msra.mxu0 %v3303_v52 }
 0x123   : > { %2972 = vmatpush3.bf16.msra.mxu1 %v3305_v54  ;;  %2951 = vmatprep.subr.bf16.mxu0 %v3306_v55  ;;  %v3318_v55 = vld [vmem:[#allocation10 + $0x40] sm:$0xff]  }
 0x124   : > { %2973 = vmatprep.subr.bf16.mxu1 %v3308_v56  ;;  %v3319_v56 = vld [vmem:[#allocation10 + $0x80] sm:$0xff]  }
 0x126   : > { %2952 = vmatpush3.bf16.msra.mxu0 %v3307_v57  ;;  %v3320_v57 = vld [vmem:[#allocation10] sm:$0xff]  }
 0x127   : > { %2974 = vmatpush3.bf16.msra.mxu1 %v3309_v58  ;;  %3052 = vmatprep.subr.bf16.mxu0 %v3624_v0  ;;  %v3321_v58 = vld [vmem:[#allocation10 + $0x48] sm:$0xff]  }
 0x128   : > { %2990 = vmatprep.subr.bf16.mxu1 %v3318_v55  ;;  %v3346_v55 = vld [vmem:[#allocation12 + $0x50] sm:$0xff]  }
 0x1bc   : > { %v2865_v59 = vpop.f32.mrb[0].mxu0 }
 0x1bd   : > { %v2887_v60 = vpop.f32.mrb[0].mxu1  ;;  %v2866_v61 = vpop.f32.mrb[1].mxu0 }
 0x1be   : > { %v2888_v62 = vpop.f32.mrb[1].mxu1  ;;  %v2867_v63 = vadd.f32 %v2866_v61, %v2865_v59  ;;  %v2868_v2 = vpop.f32.mrb[2].mxu0  ;;  %v3322_v59 = vld [vmem:[#allocation10 + $0x88] sm:$0xff]   ;;  %v3324_v61 = vld [vmem:[#allocation10 + $0x50] sm:$0xff]  }
 0x1bf   : > { %v2889_v1 = vadd.f32 %v2888_v62, %v2887_v60  ;;  %v2890_v3 = vpop.f32.mrb[2].mxu1  ;;  %v2869_v4 = vpop.f32.mrb[3].mxu0  ;;  %v3323_v60 = vld [vmem:[#allocation10 + $0x8] sm:$0xff]   ;;  %v3325_v62 = vld [vmem:[#allocation10 + $0x90] sm:$0xff]  }
 0x1c0   : > { %v2891_v5 = vpop.f32.mrb[3].mxu1  ;;  %v2870_v7 = vadd.f32 %v2869_v4, %v2868_v2  ;;  %v3328_v2 = vld [vmem:[#allocation10 + $0x98] sm:$0xff]   ;;  %v3330_v4 = vld [vmem:[#allocation10 + $0x60] sm:$0xff]  }
 0x1c1   : > { %v1303_v6 = vadd.f32 %v2889_v1, %v2867_v63  ;;  %v2892_v8 = vadd.f32 %v2891_v5, %v2890_v3  ;;  %v3326_v63 = vld [vmem:[#allocation10 + $0x10] sm:$0xff]   ;;  %v3327_v1 = vld [vmem:[#allocation10 + $0x58] sm:$0xff]   ;;  %v3331_v5 = vld [vmem:[#allocation10 + $0xa0] sm:$0xff]  }
 0x1c2   : > { %v3329_v3 = vld [vmem:[#allocation10 + $0x18] sm:$0xff]  }
 0x1c3   : > { %v1306_v9 = vadd.f32 %v2892_v8, %v2870_v7  ;;  %v3333_v7 = vld [vmem:[#allocation10 + $0x68] sm:$0xff]  }
 0x1c4   : > { %v3334_v8 = vld [vmem:[#allocation10 + $0xa8] sm:$0xff]  }
 0x1dc   : > { %v2909_v10 = vpop.f32.mrb[4].mxu0 }
 0x1dd   : > { %v2931_v11 = vpop.f32.mrb[4].mxu1  ;;  %v2910_v12 = vpop.f32.mrb[5].mxu0 }
 0x1de   : > { %v2932_v13 = vpop.f32.mrb[5].mxu1  ;;  %v2911_v14 = vadd.f32 %v2910_v12, %v2909_v10  ;;  %v2912_v16 = vpop.f32.mrb[6].mxu0  ;;  %v3336_v10 = vld [vmem:[#allocation10 + $0x70] sm:$0xff]  }
 0x1df   : > { %v2933_v15 = vadd.f32 %v2932_v13, %v2931_v11  ;;  %v2934_v17 = vpop.f32.mrb[6].mxu1  ;;  %v2913_v18 = vpop.f32.mrb[7].mxu0  ;;  %v3337_v11 = vld [vmem:[#allocation10 + $0xb0] sm:$0xff]   ;;  %v3339_v13 = vld [vmem:[#allocation10 + $0x78] sm:$0xff]  }
 0x1e0   : > { %v2935_v19 = vpop.f32.mrb[7].mxu1  ;;  %v1344_v20 = vadd.f32 %v2911_v14, %v1303_v6  ;;  %v2914_v21 = vadd.f32 %v2913_v18, %v2912_v16  ;;  %v3332_v6 = vld [vmem:[#allocation10 + $0x20] sm:$0xff]   ;;  %v3338_v12 = vld [vmem:[#allocation10 + $0x30] sm:$0xff]   ;;  %v3340_v14 = vld [vmem:[#allocation10 + $0xb8] sm:$0xff]  }
 0x1e1   : > { %v2936_v22 = vadd.f32 %v2935_v19, %v2934_v17 }
 0x1e2   : > { %v1385_v24 = vadd.f32 %v2933_v15, %v1344_v20  ;;  %v1347_v25 = vadd.f32 %v2914_v21, %v1306_v9  ;;  %v3335_v9 = vld [vmem:[#allocation10 + $0x28] sm:$0xff]   ;;  %v3341_v15 = vld [vmem:[#allocation10 + $0x38] sm:$0xff]  }
 0x1e4   : > { %v1398_v27 = vmul.f32 %v2747_v23, %v1385_v24  ;;  %v1388_v28 = vadd.f32 %v2936_v22, %v1347_v25 }
 0x1e6   : > { %v1407_v29 = vadd.f32 %v2748_v26, %v1398_v27  ;;  %v1399_v30 = vmul.f32 %v2747_v23, %v1388_v28 }
 0x1e8   : > { %v1409_v31 = vmax.f32 %v1407_v29, 0.0  ;;  %v1408_v32 = vadd.f32 %v2748_v26, %v1399_v30 }
 0x1ea   : > { %1411 = vst [vmem:[#allocation2 + $0x3] sm:$0xff] %v1409_v31  ;;  %v1410_v33 = vmax.f32 %v1408_v32, 0.0 }
 0x1ec   : > { %1412 = vst [vmem:[#allocation2 + $0xb] sm:$0xff] %v1410_v33  ;;  %v1423_v34 = vpack.c.bf16 %v1410_v33, %v1409_v31  ;;  %v2789_v31 = vld [vmem:[%s4117_s5] ss:$0 sm:$0xff] }
 0x1f1   : > { %v1417_v35 = vld [vmem:[#allocation2 + $0x2] sm:$0xff] }
 0x1f2   : > { %v1413_v41 = vld [vmem:[#allocation2 + $0x1] sm:$0xff] }
 0x1f3   : > { %v1418_v36 = vld [vmem:[#allocation2 + $0xa] sm:$0xff] }
 0x1f4   : > { %v1425_v37 = vld [vmem:[#allocation2 + $0x4] sm:$0xff]  ;;  %v1426_v38 = vld [vmem:[#allocation2 + $0xc] sm:$0xff]  ;;  %v1419_v39 = vpack.c.bf16 %v1418_v36, %v1417_v35 }
 0x1f5   : > { %v1427_v40 = vpack.c.bf16 %v1426_v38, %v1425_v37  ;;  %v1414_v42 = vld [vmem:[#allocation2 + $0x9] sm:$0xff] }
 0x1f6   : > { %v1415_v44 = vpack.c.bf16 %v1414_v42, %v1413_v41  ;;  %1790 = vmatprep.mubr.bf16.mxu0 %v1419_v39  ;;  %v1429_v52 = vld [vmem:[#allocation2 + $0x5] sm:$0xff]  ;;  %v1430_v53 = vld [vmem:[#allocation2 + $0xd] sm:$0xff] }
 0x1f7   : > { %1831 = vmatprep.mubr.bf16.mxu1 %v1427_v40  ;;  %v1431_v54 = vpack.c.bf16 %v1430_v53, %v1429_v52  ;;  %v3343_v52 = vld [vmem:[#allocation12] sm:$0xff]   ;;  %v3344_v53 = vld [vmem:[#allocation12 + $0x48] sm:$0xff]  }
 0x1f8   : > { %1791 = vmatmul.mubr.bf16.vlgmr.msra.gmra.mrb[8].mxu0 %v1415_v44  ;;  %1832 = vmatmul.mubr.bf16.vlgmr.msra.gmra.mrb[8].mxu1 %v1423_v34  ;;  %v2790_v34 = vld [vmem:[%s4118_s6] ss:$0 sm:$0xff] }
 0x1f9   : > { %3053 = vmatpush3.bf16.msra.mxu0 %v3310_v43  ;;  %3068 = vmatprep.mubr.msk.bf16.mxu0 %vm3625_vm0, %v3624_v0 }
 0x1fa   : > { %3054 = vmatprep.subr.bf16.mxu0 %v3624_v0  ;;  %2991 = vmatpush3.bf16.msra.mxu1 %v3320_v57  ;;  %v3348_v57 = vld [vmem:[#allocation12 + $0x58] sm:$0xff]  }
 0x1fb   : > { %2992 = vmatprep.subr.bf16.mxu1 %v3321_v58  ;;  %v3349_v58 = vld [vmem:[#allocation12 + $0x18] sm:$0xff]  }
 0x1fd   : > { %3055 = vmatpush3.bf16.msra.mxu0 %v3311_v45 }
 0x1fe   : > { %3056 = vmatprep.subr.bf16.mxu0 %v3624_v0  ;;  %2993 = vmatpush3.bf16.msra.mxu1 %v3323_v60  ;;  %v3351_v60 = vld [vmem:[#allocation12 + $0x20] sm:$0xff]  }
 0x1ff   : > { %2994 = vmatprep.subr.bf16.mxu1 %v3324_v61  ;;  %v3352_v61 = vld [vmem:[#allocation12 + $0x68] sm:$0xff]  }
 0x201   : > { %3057 = vmatpush3.bf16.msra.mxu0 %v3312_v46 }
 0x202   : > { %3058 = vmatprep.subr.bf16.mxu0 %v3624_v0  ;;  %2995 = vmatpush3.bf16.msra.mxu1 %v3326_v63  ;;  %v3354_v63 = vld [vmem:[#allocation12 + $0x70] sm:$0xff]  }
 0x203   : > { %2996 = vmatprep.subr.bf16.mxu1 %v3327_v1  ;;  %v3355_v1 = vld [vmem:[#allocation12 + $0x30] sm:$0xff]  }
 0x205   : > { %3059 = vmatpush3.bf16.msra.mxu0 %v3313_v47 }
 0x206   : > { %3060 = vmatprep.subr.bf16.mxu0 %v3624_v0  ;;  %2997 = vmatpush3.bf16.msra.mxu1 %v3329_v3  ;;  %v3357_v3 = vld [vmem:[#allocation12 + $0x38] sm:$0xff]  }
 0x207   : > { %2998 = vmatprep.subr.bf16.mxu1 %v3330_v4  ;;  %v3358_v4 = vld [vmem:[#allocation13] sm:$0xff]  }
 0x209   : > { %3061 = vmatpush3.bf16.msra.mxu0 %v3314_v48 }
 0x20a   : > { %3062 = vmatprep.subr.bf16.mxu0 %v3624_v0  ;;  %2999 = vmatpush3.bf16.msra.mxu1 %v3332_v6  ;;  %v3360_v6 = vld [vmem:[#allocation13 + $0x10] sm:$0xff]  }
 0x20b   : > { %3000 = vmatprep.subr.bf16.mxu1 %v3333_v7  ;;  %v3361_v7 = vld [vmem:[#allocation13 + $0x18] sm:$0xff]  }
 0x20d   : > { %3063 = vmatpush3.bf16.msra.mxu0 %v3315_v49 }
 0x20e   : > { %3064 = vmatprep.subr.bf16.mxu0 %v3624_v0  ;;  %3001 = vmatpush3.bf16.msra.mxu1 %v3335_v9 }
 0x20f   : > { %3002 = vmatprep.subr.bf16.mxu1 %v3336_v10 }
 0x211   : > { %3065 = vmatpush3.bf16.msra.mxu0 %v3316_v50 }
 0x212   : > { %3066 = vmatprep.subr.bf16.mxu0 %v3624_v0  ;;  %3003 = vmatpush3.bf16.msra.mxu1 %v3338_v12 }
 0x213   : > { %3004 = vmatprep.subr.bf16.mxu1 %v3339_v13 }
 0x215   : > { %3067 = vmatpush3.bf16.msra.mxu0 %v3317_v51  ;;  %v3342_v51 = vld [vmem:[#allocation12 + $0x40] sm:$0xff]  }
 0x216   : > { %3072 = vmatprep.subr.bf16.mxu0 %v3624_v0  ;;  %3005 = vmatpush3.bf16.msra.mxu1 %v3341_v15 }
 0x217   : > { %3021 = vmatprep.subr.bf16.mxu1 %v3342_v51 }
 0x218   : > { %3069 = vmatmul.mubr.bf16.vlgmr.msra.gmra.mrb[12].mxu0 %v1431_v54  ;;  %v3345_v54 = vld [vmem:[#allocation12 + $0x8] sm:$0xff]  }
 0x219   : > { %3088 = vmatprep.mubr.msk.bf16.mxu0 %vm3625_vm0, %v3624_v0  ;;  %3073 = vmatpush3.bf16.msra.mxu0 %v3319_v56  ;;  %v3347_v56 = vld [vmem:[#allocation12 + $0x10] sm:$0xff]  }
 0x21a   : > { %3074 = vmatprep.subr.bf16.mxu0 %v3624_v0 }
 0x21d   : > { %3075 = vmatpush3.bf16.msra.mxu0 %v3322_v59  ;;  %v3350_v59 = vld [vmem:[#allocation12 + $0x60] sm:$0xff]  }
 0x21e   : > { %3076 = vmatprep.subr.bf16.mxu0 %v3624_v0 }
 0x221   : > { %3077 = vmatpush3.bf16.msra.mxu0 %v3325_v62  ;;  %v3353_v62 = vld [vmem:[#allocation12 + $0x28] sm:$0xff]  }
 0x222   : > { %3078 = vmatprep.subr.bf16.mxu0 %v3624_v0 }
 0x225   : > { %3079 = vmatpush3.bf16.msra.mxu0 %v3328_v2  ;;  %v3356_v2 = vld [vmem:[#allocation12 + $0x78] sm:$0xff]  }
 0x226   : > { %3080 = vmatprep.subr.bf16.mxu0 %v3624_v0 }
 0x229   : > { %3081 = vmatpush3.bf16.msra.mxu0 %v3331_v5  ;;  %v3359_v5 = vld [vmem:[#allocation13 + $0x8] sm:$0xff]  }
 0x22a   : > { %3082 = vmatprep.subr.bf16.mxu0 %v3624_v0 }
 0x22d   : > { %3083 = vmatpush3.bf16.msra.mxu0 %v3334_v8  ;;  %v3362_v8 = vld [vmem:[#allocation13 + $0x20] sm:$0xff]  }
 0x22e   : > { %3084 = vmatprep.subr.bf16.mxu0 %v3624_v0 }
 0x231   : > { %3085 = vmatpush3.bf16.msra.mxu0 %v3337_v11 }
 0x232   : > { %3086 = vmatprep.subr.bf16.mxu0 %v3624_v0 }
 0x235   : > { %3087 = vmatpush3.bf16.msra.mxu0 %v3340_v14 }
 0x236   : > { %3092 = vmatprep.subr.bf16.mxu0 %v3624_v0 }
 0x2cb   : > { %v2953_v16 = vpop.f32.mrb[8].mxu0  ;;  %v2975_v17 = vpop.f32.mrb[8].mxu1 }
 0x2cc   : > { %v2954_v18 = vpop.f32.mrb[9].mxu0  ;;  %v2976_v19 = vpop.f32.mrb[9].mxu1 }
 0x2cd   : > { %v2955_v20 = vadd.f32 %v2954_v18, %v2953_v16  ;;  %v2977_v21 = vadd.f32 %v2976_v19, %v2975_v17  ;;  %v2956_v22 = vpop.f32.mrb[10].mxu0  ;;  %v2978_v23 = vpop.f32.mrb[10].mxu1  ;;  %v2815_v16 = vld [vmem:[%s4120_s8] ss:$0 sm:$0xff] }
 0x2ce   : > { %v2957_v24 = vpop.f32.mrb[11].mxu0  ;;  %v2979_v25 = vpop.f32.mrb[11].mxu1 }
 0x2cf   : > { %v2958_v26 = vadd.f32 %v2957_v24, %v2956_v22  ;;  %v2980_v27 = vadd.f32 %v2979_v25, %v2978_v23  ;;  %v1834_v28 = vadd.f32 %v2977_v21, %v2955_v20  ;;  %v2816_v21 = vld [vmem:[%s4171_s17] ss:$0 sm:$0xff]  ;;  %s4175_s17 = sld [smem:[#allocation28_spill]] }
 0x2d1   : > { %v1837_v29 = vadd.f32 %v2980_v27, %v2958_v26 }
 0x2eb   : > { %v1874_v30 = vpop.f32.mrb[12].mxu0 }
 0x2ec   : > { %v1875_v32 = vadd.f32 %v1874_v30, %v1834_v28  ;;  %v3070_v33 = vpop.f32.mrb[13].mxu0 }
 0x2ed   : > { %v1877_v35 = vpop.f32.mrb[14].mxu0 }
 0x2ee   : > { %v1888_v36 = vmul.f32 %v2789_v31, %v1875_v32  ;;  %v1878_v37 = vadd.f32 %v1877_v35, %v1837_v29  ;;  %v3071_v38 = vpop.f32.mrb[15].mxu0  ;;  %v2229_v29 = vlaneseq }
 0x2f0   : > { %v1897_v39 = vadd.f32 %v2790_v34, %v1888_v36  ;;  %v1889_v40 = vmul.f32 %v2789_v31, %v1878_v37 }
 0x2f2   : > { %v1899_v41 = vmax.f32 %v1897_v39, 0.0  ;;  %v1898_v42 = vadd.f32 %v2790_v34, %v1889_v40  ;;  %v2230_v34 = vshrl.u32 %v2229_v29, 7  ;;  %v2227_v40 = vld [vmem:[%s4172_s9] sm:$0x3]  ;;  %s4176_s9 = sld [smem:[#allocation29_spill]] }
 0x2f4   : > { %1901 = vst [vmem:[#allocation2 + $0x3] sm:$0xff] %v1899_v41  ;;  %v1900_v43 = vmax.f32 %v1898_v42, 0.0  ;;  %v2235_v39 = vsub.s32 1, %v2230_v34 }
 0x2f6   : > { %1902 = vst [vmem:[#allocation2 + $0xb] sm:$0xff] %v1900_v43  ;;  %v1909_v44 = vpack.c.bf16 %v1900_v43, %v1899_v41  ;;  %v2231_v43 = vsub.s32 0, %v2230_v34 }
 0x2f8   : > { %2142 = vmatprep.mubr.bf16.mxu1 %v1909_v44  ;;  %v2241_v44 = vld [vmem:[%s4173_s14] sm:$0x3]  ;;  %s4177_s14 = sld [smem:[#allocation30_spill]] }
 0x2fb   : > { %v1903_v45 = vld [vmem:[#allocation2 + $0x2] sm:$0xff] }
 0x2fd   : > { %v1911_v46 = vld [vmem:[#allocation2 + $0x4] sm:$0xff]  ;;  %v1912_v47 = vld [vmem:[#allocation2 + $0xc] sm:$0xff] }
 0x2fe   : > { %v1904_v48 = vld [vmem:[#allocation2 + $0xa] sm:$0xff]  ;;  %v1913_v49 = vpack.c.bf16 %v1912_v47, %v1911_v46  ;;  %v2236_v46 = vrot.slane %v2227_v40, %v2235_v39 }
 0x2ff   : > { %v1905_v50 = vpack.c.bf16 %v1904_v48, %v1903_v45 }
 0x300   : > { %3089 = vmatmul.mubr.bf16.vlgmr.msra.gmra.mrb[16].mxu0 %v1913_v49  ;;  %v2232_v49 = vrot.slane %v2227_v40, %v2231_v43 }
 0x301   : > { %2143 = vmatmul.mubr.bf16.vlgmr.msra.gmra.mrb[12].mxu1 %v1905_v50  ;;  %3108 = vmatprep.mubr.msk.bf16.mxu0 %vm3625_vm0, %v3624_v0  ;;  %v2250_v50 = vrot.slane %v2241_v44, %v2235_v39 }
 0x302   : > { %3022 = vmatpush3.bf16.msra.mxu1 %v3343_v52  ;;  %3093 = vmatpush3.bf16.msra.mxu0 %v3358_v4 }
 0x303   : > { %3023 = vmatprep.subr.bf16.mxu1 %v3344_v53  ;;  %3094 = vmatprep.subr.bf16.mxu0 %v3624_v0  ;;  %v2246_v53 = vrot.slane %v2241_v44, %v2231_v43 }
 0x306   : > { %3024 = vmatpush3.bf16.msra.mxu1 %v3345_v54  ;;  %3095 = vmatpush3.bf16.msra.mxu0 %v3359_v5 }
 0x307   : > { %3025 = vmatprep.subr.bf16.mxu1 %v3346_v55  ;;  %3096 = vmatprep.subr.bf16.mxu0 %v3624_v0 }
 0x30a   : > { %3026 = vmatpush3.bf16.msra.mxu1 %v3347_v56  ;;  %3097 = vmatpush3.bf16.msra.mxu0 %v3360_v6 }
 0x30b   : > { %3027 = vmatprep.subr.bf16.mxu1 %v3348_v57  ;;  %3098 = vmatprep.subr.bf16.mxu0 %v3624_v0 }
 0x30e   : > { %3028 = vmatpush3.bf16.msra.mxu1 %v3349_v58  ;;  %3099 = vmatpush3.bf16.msra.mxu0 %v3361_v7  ;;  %v2427_v7 = vld [vmem:[%s4175_s17] sm:$0x1]  ;;  %s4178_s17 = sld [smem:[#allocation31_spill]] }
 0x30f   : > { %3029 = vmatprep.subr.bf16.mxu1 %v3350_v59  ;;  %3100 = vmatprep.subr.bf16.mxu0 %v3624_v0 }
 0x312   : > { %3030 = vmatpush3.bf16.msra.mxu1 %v3351_v60  ;;  %3101 = vmatpush3.bf16.msra.mxu0 %v3362_v8  ;;  %v3363_v60 = vld [vmem:[#allocation13 + $0x28] sm:$0xff]  }
 0x313   : > { %3031 = vmatprep.subr.bf16.mxu1 %v3352_v61  ;;  %3102 = vmatprep.subr.bf16.mxu0 %v3624_v0  ;;  %v3364_v61 = vld [vmem:[#allocation13 + $0x30] sm:$0xff]  }
 0x314   : > { %s4068_s13 = scalar_lea.hbm %s4178_s17, %s2841_s22 }
 0x316   : > { %3032 = vmatpush3.bf16.msra.mxu1 %v3353_v62  ;;  %3103 = vmatpush3.bf16.msra.mxu0 %v3363_v60  ;;  %v3365_v62 = vld [vmem:[#allocation13 + $0x38] sm:$0xff]  }
 0x317   : > { %3033 = vmatprep.subr.bf16.mxu1 %v3354_v63  ;;  %3104 = vmatprep.subr.bf16.mxu0 %v3624_v0 }
 0x31a   : > { %3034 = vmatpush3.bf16.msra.mxu1 %v3355_v1  ;;  %3105 = vmatpush3.bf16.msra.mxu0 %v3364_v61  ;;  %v2289_v1 = vld [vmem:[%s4174_s23] sm:$0x1]  ;;  %s2551_s23 = sshll.u32 %s665_s25, 4  ;;  %s4070_s23 = int_to_ptr.vmem [resolvable:$true] %s2551_s23 }
 0x31b   : > { %3035 = vmatprep.subr.bf16.mxu1 %v3356_v2  ;;  %3106 = vmatprep.subr.bf16.mxu0 %v3624_v0  ;;  %v2429_v0 = vld [vmem:[%s4176_s9] sm:$0x1]  ;;  %s3536_s1 = scalar_lea.vmem %s4070_s23, 16  ;;  %s3626_s9 = smov [#allocation15]  }
 0x31c   : > { %p3537_p7 = scmp.ne.s32.totalorder %s4070_s23, %s3536_s1  ;;  %s3540_s2 = sshll.u32 %s3626_s9, 4  ;;  %s3541_s2 = int_to_ptr.vmem [resolvable:$false] %s3540_s2 }
 0x31d   : > { %s3542_s19 = scalar_lea.vmem %s3541_s2, 32  ;;  %p3543_p13 = scmp.lt.s32.totalorder %s4070_s23, %s3541_s2 }
 0x31e   : > { %3036 = vmatpush3.bf16.msra.mxu1 %v3357_v3  ;;  %3107 = vmatpush3.bf16.msra.mxu0 %v3365_v62  ;;  %p3538_p12 = pnand %p3537_p7, %p4179_p4  ;;  %p3544_p0 = scmp.lt.s32.totalorder %s3542_s19, %s3536_s1 }
 0x320   : > { %p3539_p1 = pneg %p3538_p12  ;;  %p3545_p2 = por %p3544_p0, %p3543_p13 }
 0x322   : > { %p3546_p8 = pnand %p3545_p2, %p3539_p1 }
 0x3d3   : > { %v2185_v9 = vpop.f32.mrb[16].mxu0 }
 0x3d4   : > { %v3006_v10 = vpop.f32.mrb[12].mxu1  ;;  %v3090_v11 = vpop.f32.mrb[17].mxu0 }
 0x3d5   : > { %v3007_v12 = vpop.f32.mrb[13].mxu1  ;;  %v2188_v14 = vpop.f32.mrb[18].mxu0 }
 0x3d6   : > { %v3008_v13 = vadd.f32 %v3007_v12, %v3006_v10  ;;  %v3009_v15 = vpop.f32.mrb[14].mxu1  ;;  %v3091_v17 = vpop.f32.mrb[19].mxu0  ;;  %v2448_v12 = vld [vmem:[%s4177_s14] sm:$0x1] }
 0x3d7   : > { %v3010_v18 = vpop.f32.mrb[15].mxu1 }
 0x3d8   : > { %v2186_v19 = vadd.f32 %v3008_v13, %v2185_v9  ;;  %v3011_v20 = vadd.f32 %v3010_v18, %v3009_v15 }
 0x3da   : > { %v2199_v22 = vmul.f32 %v2815_v16, %v2186_v19  ;;  %v2189_v23 = vadd.f32 %v3011_v20, %v2188_v14 }
 0x3dc   : > { %v2208_v24 = vadd.f32 %v2816_v21, %v2199_v22  ;;  %v2200_v25 = vmul.f32 %v2815_v16, %v2189_v23 }
 0x3de   : > { %v2209_v26 = vadd.f32 %v2816_v21, %v2200_v25  ;;  %v2210_v27 = vmax.f32 %v2208_v24, 0.0 }
 0x3e0   : > { %v2211_v28 = vmax.f32 %v2209_v26, 0.0 }
 0x3e2   : > { %v2212_v30 = vadd.f32 %v2211_v28, %v2210_v27  ;;  %v2220_v31 = vmax.f32 %v2210_v27, %v2211_v28 }
 0x3e4   : > { %v2213_v32 = vrot.slane %v2212_v30, 4  ;;  %v2221_v33 = vrot.slane %v2220_v31, 4 }
 0x3e6   : > { %v2214_v35 = vadd.f32 %v2213_v32, %v2212_v30  ;;  %v2222_v36 = vmax.f32 %v2220_v31, %v2221_v33 }
 0x3e8   : > { %v2215_v37 = vrot.slane %v2214_v35, 2  ;;  %v2223_v38 = vrot.slane %v2222_v36, 2 }
 0x3ea   : > { %v2216_v41 = vadd.f32 %v2215_v37, %v2214_v35  ;;  %v2224_v42 = vmax.f32 %v2222_v36, %v2223_v38 }
 0x3ec   : > { %v2225_v45 = vrot.slane %v2224_v42, 1  ;;  %v2217_v47 = vrot.slane %v2216_v41, 1 }
 0x3ee   : > { %v2226_v48 = vmax.f32 %v2224_v42, %v2225_v45  ;;  %v2218_v51 = vadd.f32 %v2217_v47, %v2216_v41 }
 0x3f0   : > { %v2240_v52 = vmul.f32 %v2236_v46, %v2226_v48  ;;  %v2219_v54 = vmul.f32 0.0625, %v2218_v51 }
 0x3f2   : > { %v2254_v55 = vadd.f32 %v2250_v50, %v2240_v52  ;;  %v2239_v56 = vmul.f32 %v2232_v49, %v2219_v54 }
 0x3f4   : > { %v2256_v57 = vpack.c.bf16 %v2254_v55, %v2254_v55  ;;  %v2253_v58 = vadd.f32 %v2246_v53, %v2239_v56 }
 0x3f6   : > { %2418 = vmatprep.mubr.bf16.mxu1 %v2256_v57  ;;  %v2255_v59 = vpack.c.bf16 %v2253_v58, %v2253_v58 }
 0x3f8   : > { %2419 = vmatmul.mubr.bf16.vlgmr.msra.gmra.mrb[16].mxu1 %v2255_v59 }
 0x4cb   : > { %v3037_v63 = vpop.f32.mrb[16].mxu1 }
 0x4cc   : > { %v3038_v2 = vpop.f32.mrb[17].mxu1 }
 0x4cd   : > { %v3039_v3 = vadd.f32 %v3038_v2, %v3037_v63  ;;  %v3040_v4 = vpop.f32.mrb[18].mxu1 }
 0x4ce   : > { %v3041_v5 = vpop.f32.mrb[19].mxu1 }
 0x4cf   : > { %v2421_v6 = vadd.f32 %v3039_v3, %v2289_v1 }
 0x4d1   : > { %v2426_v8 = vmax.f32 %v2421_v6, 0.0 }
 0x4d3   : > { %v2428_v9 = vmul.f32 %v2427_v7, %v2426_v8 }
 0x4d5   : > { %v2430_v10 = vadd.f32 %v2429_v0, %v2428_v9 }
 0x4d7   : > { %v2431_v11 = vpack.c.bf16 %v2430_v10, %v2430_v10 }
 0x4d9   : > { %3109 = vmatmul.mubr.bf16.vlgmr.msra.gmra.mrb[20].mxu0 %v2431_v11 }
 0x5ac   : > { %v2531_v13 = vpop.f32.mrb[20].mxu0 }
 0x5ad   : > { %v2532_v14 = vadd.f32 %v2531_v13, %v2448_v12  ;;  %v3110_v15 = vpop.f32.mrb[21].mxu0 }
 0x5ae   : > { %v2534_v16 = vpop.f32.mrb[22].mxu0 }
 0x5af   : > { %2537 = vst [vmem:[%s665_s25] sm:$0x1] %v2532_v14  ;;  %v3111_v17 = vpop.f32.mrb[23].mxu0 }
 0x5b0   : > { %3549 = shalt.err (!%p3546_p8)
}
 0x5b1   : > { %s3550_s0 = scalar_lea.hbm %s4068_s13, 16  ;;  %s3554_s25 = scalar_lea.hbm %s4178_s17, 32 }
 0x5b2   : > { %p3551_p6 = scmp.ne.s32.totalorder %s4068_s13, %s3550_s0  ;;  %p3555_p3 = scmp.lt.u32.totalorder %s4068_s13, %s4178_s17 }
 0x5b3   : > { %p3556_p5 = scmp.lt.u32.totalorder %s3554_s25, %s3550_s0  ;;  %p3558_p7 = scmp.lt.u32.totalorder %s3550_s0, %s4068_s13 }
 0x5b4   : > { %p3552_p10 = pnand %p3551_p6, %p4179_p4 }
 0x5b5   : > { %p3557_p9 = por %p3556_p5, %p3555_p3 }
 0x5b6   : > { %p3553_p11 = pneg %p3552_p10 }
 0x5b7   : > { %p3559_p12 = por %p3558_p7, %p3557_p9 }
 0x5b9   : > { %p3560_p1 = pnand %p3559_p12, %p3553_p11 }
 0x5bb   : > { %3563 = shalt.err (!%p3560_p1)
}
 0x5bc   : > { %3134 = dma.vmem_to_hbm [thread:$0]  (%p4179_p4), %s4070_s23, 16, %s4068_s13, %s2539_s24  }
 0x5bd PF: > { %s2563_s1 = sand.u32 1, %s3602_s27   ;;  %p4180_p13 = scmp.ne.s32.totalorder %s4158_s26, 0 }
 0x5be   : > { %p4181_p0 = scmp.ge.s32.totalorder %s3614_s30, 2  ;;  %s2564_s9 = scalar_lea.sflag [#allocation6], %s2563_s1 }
 0x5c0   : > { %p3157_p2 = pnand %p4181_p0, %p4180_p13 }
 0x5c2   : > { %3597 = dma.done.wait (!%p3157_p2), %s2564_s9, 16  }
 0x5c3   : > { %3599 = vsyncadd (!%p3157_p2), %s2564_s9, 4294967280  ;;  %p34_p8 = scmp.ge.s32.totalorder %s3895_s21, 4   ;;  %s4182_s27 = smov %s3606_s28 }
 0x5c4   : > { %s4183_s28 = smov %s3610_s29  ;;  %s4184_s29 = smov %s3907_s10 }
 0x5c5   : > { %s4185_s30 = smov %s3895_s21  ;;  %36 = sbr.rel (!%p34_p8) target bundleno = 20 (0x14), region = 157 }
 0x5cc   :  { %2568 = vsyncpa [#allocation5], 1 }
 0x5cd   :  { %2570 = vsyncpa [#allocation5 + $0x1], 1 }
 0x5ce   :  { %2571 = vsyncpa [#allocation8], 1 }
 0x5cf   :  { %2572 = vsyncpa [#allocation11], 1 }
 0x5d0   :  { %2573 = vsyncpa [#allocation14], 1 }
 0x5d1   :  { %2574 = vsyncpa [#allocation6], 1 }
 0x5d2   :  { %2576 = vsyncpa [#allocation6 + $0x1], 1 }

</bundles_post_ra>
